<compile_context>
chip_gen: v5e
topology: v5e:2x2
jax: 0.10.0
libtpu: 0.0.40
codegen_flags: <defaults>
</compile_context>

<pallas_src>
import jax
import jax.numpy as jnp
from jax.experimental import pallas as pl
from jax.experimental.pallas import tpu as pltpu

HIDDEN = 128
IN_DIM = 1
OUT_DIM = 4


def _use_bf16_elementwise():
    """bf16 bias/ReLU only on chips whose VPU has native bf16 ALUs (v6e, v7x)."""
    try:
        kind = jax.devices()[0].device_kind.lower()
    except Exception:
        return True
    return not any(s in kind for s in ("v2", "v3", "v4", "v5"))


def _make_kernel(use_bf16_act):
    def _mlp_kernel(x_ref, w1_ref, bh_ref, wh_ref, w5_ref, b5_ref, o_ref):
        bh = bh_ref[...]                                              # (4, 128) f32
        # Layer 1: Linear(1, 128) == lane-broadcast multiply on the VPU (f32).
        h32 = jnp.maximum(x_ref[...] * w1_ref[...] + bh[0:1, :], 0.0)  # (tile_b, 128)
        if use_bf16_act:
            # v6e / v7x: keep activations resident in bf16 between layers.
            h = h32.astype(jnp.bfloat16)
            for l in range(3):
                acc = jnp.dot(h, wh_ref[l], preferred_element_type=jnp.float32)
                b_bf = bh[l + 1:l + 2, :].astype(jnp.bfloat16)   # (1,128): 1 vreg cast
                h = jnp.maximum(acc.astype(jnp.bfloat16) + b_bf, 0.0)
        else:
            # v5e and older: f32 elementwise (no bf16 VPU), bf16 MXU operands.
            for l in range(3):
                acc = jnp.dot(h32.astype(jnp.bfloat16), wh_ref[l],
                              preferred_element_type=jnp.float32)
                h32 = jnp.maximum(acc + bh[l + 1:l + 2, :], 0.0)
            h = h32.astype(jnp.bfloat16)
        # Output layer: 128 -> 4, no activation, f32 accumulate + f32 bias.
        o = jnp.dot(h, w5_ref[...], preferred_element_type=jnp.float32)
        o_ref[...] = (o + b5_ref[...]).astype(o_ref.dtype)
    return _mlp_kernel


def orbitnet_forward(t, params, *, tile_b=2048, use_bf16_act=None):
    """t: (B, 1) float32. Returns (B, 4) float32."""
    if use_bf16_act is None:
        use_bf16_act = _use_bf16_elementwise()
    (w1, b1), (w2, b2), (w3, b3), (w4, b4), (w5, b5) = params
    B = t.shape[0]

    # Tile selection: multiple of 8 sublanes; big enough to amortize the
    # ~0.35us/step pipeline overhead, but capped so the grid keeps >= 2 steps
    # (both v7x TensorCores get work) whenever the batch is large enough.
    B8 = ((B + 7) // 8) * 8
    tile_b = max(8, (tile_b // 8) * 8)
    if B8 >= 16:
        half = (((B8 + 1) // 2 + 7) // 8) * 8     # round_up(ceil(B8/2), 8)
        tile_b = min(tile_b, half)
    tile_b = max(8, min(tile_b, B8))
    B_pad = ((B + tile_b - 1) // tile_b) * tile_b

    x = t.astype(jnp.float32)
    if B_pad != B:
        x = jnp.zeros((B_pad, IN_DIM), jnp.float32).at[:B].set(x)

    w1_row = w1.reshape(1, HIDDEN).astype(jnp.float32)           # (1, 128) f32
    bh = jnp.stack([b1, b2, b3, b4]).astype(jnp.float32)         # (4, 128) f32
    wh = jnp.stack([w2, w3, w4]).astype(jnp.bfloat16)            # (3, 128, 128) bf16
    w5_bf = w5.astype(jnp.bfloat16)                              # (128, 4) bf16
    b5_row = b5.reshape(1, OUT_DIM).astype(jnp.float32)          # (1, 4) f32

    flops = 2 * B_pad * (IN_DIM * HIDDEN + 3 * HIDDEN * HIDDEN + HIDDEN * OUT_DIM)
    weight_bytes = (HIDDEN * 4 + 4 * HIDDEN * 4
                    + 3 * HIDDEN * HIDDEN * 2 + HIDDEN * OUT_DIM * 2 + OUT_DIM * 4)
    bytes_accessed = B_pad * (IN_DIM + OUT_DIM) * 4 + weight_bytes
    cost = pl.CostEstimate(flops=flops, transcendentals=0,
                           bytes_accessed=bytes_accessed)

    out = pl.pallas_call(
        _make_kernel(use_bf16_act),
        out_shape=jax.ShapeDtypeStruct((B_pad, OUT_DIM), jnp.float32),
        grid_spec=pltpu.PrefetchScalarGridSpec(
            num_scalar_prefetch=0,
            grid=(B_pad // tile_b,),
            in_specs=[
                pl.BlockSpec((tile_b, IN_DIM), lambda i: (i, 0)),        # x
                pl.BlockSpec((1, HIDDEN), lambda i: (0, 0)),             # w1 row
                pl.BlockSpec((4, HIDDEN), lambda i: (0, 0)),             # b1..b4
                pl.BlockSpec((3, HIDDEN, HIDDEN), lambda i: (0, 0, 0)),  # w2..w4
                pl.BlockSpec((HIDDEN, OUT_DIM), lambda i: (0, 0)),       # w5
                pl.BlockSpec((1, OUT_DIM), lambda i: (0, 0)),            # b5
            ],
            out_specs=pl.BlockSpec((tile_b, OUT_DIM), lambda i: (i, 0)),
        ),
        compiler_params=pltpu.CompilerParams(
            dimension_semantics=("parallel",),
            # 32 MiB is plenty even at tile_b=4096 and stays within v7x's
            # 64 MiB physical VMEM per TensorCore.
            vmem_limit_bytes=32 * 1024 * 1024,
        ),
        cost_estimate=cost,
    )(x, w1_row, bh, wh, w5_bf, b5_row)

    return out[:B]


def init_params(key):
    """PyTorch nn.Linear default init: U(-1/sqrt(fan_in), 1/sqrt(fan_in))."""
    dims = [(1, 128), (128, 128), (128, 128), (128, 128), (128, 4)]
    params = []
    for (fan_in, fan_out) in dims:
        key, kw, kb = jax.random.split(key, 3)
        bound = 1.0 / (fan_in ** 0.5)
        w = jax.random.uniform(kw, (fan_in, fan_out), jnp.float32, -bound, bound)
        b = jax.random.uniform(kb, (fan_out,), jnp.float32, -bound, bound)
        params.append((w, b))
    return params


def reference_forward(t, params):
    """Pure-f32 reference (matches the PyTorch module semantics)."""
    h = t
    for idx, (w, b) in enumerate(params):
        h = h @ w + b
        if idx < len(params) - 1:
            h = jnp.maximum(h, 0.0)
    return h


def reference_forward_bf16(t, params):
    """Matches the kernel's v5e path: bf16 matmul operands, f32 elementwise."""
    (w1, b1) = params[0]
    h = jnp.maximum(t * w1.reshape(1, -1) + b1, 0.0)
    for idx, (w, b) in enumerate(params[1:]):
        h = jnp.dot(h.astype(jnp.bfloat16), w.astype(jnp.bfloat16),
                    preferred_element_type=jnp.float32) + b
        if idx < len(params) - 2:
            h = jnp.maximum(h, 0.0)
    return h


def reference_forward_bf16_act(t, params):
    """Matches the kernel's v6e/v7x path: bf16 matmuls + bf16 bias/ReLU."""
    (w1, b1) = params[0]
    h = jnp.maximum(t * w1.reshape(1, -1) + b1, 0.0).astype(jnp.bfloat16)
    for (w, b) in params[1:4]:
        acc = jnp.dot(h, w.astype(jnp.bfloat16), preferred_element_type=jnp.float32)
        h = jnp.maximum(acc.astype(jnp.bfloat16) + b.astype(jnp.bfloat16), 0.0)
    (w5, b5) = params[4]
    return jnp.dot(h, w5.astype(jnp.bfloat16),
                   preferred_element_type=jnp.float32) + b5


if __name__ == "__main__":
    key = jax.random.PRNGKey(0)
    params = init_params(key)

    # Deterministic scalar-time batch; 512 rows -> 2 grid steps after the
    # "keep >= 2 steps" tile cap, exercising the multi-step pipeline.
    B = 512
    t = jax.random.uniform(jax.random.PRNGKey(0), (B, IN_DIM), jnp.float32,
                           minval=0.0, maxval=2.0 * 3.14159265)

    use_bf16 = _use_bf16_elementwise()
    out = jax.block_until_ready(
        orbitnet_forward(t, params, tile_b=2048, use_bf16_act=use_bf16))
    assert out.shape == (B, OUT_DIM)

    # Check against a reference that matches the kernel's exact numerics.
    ref_match = (reference_forward_bf16_act(t, params) if use_bf16
                 else reference_forward_bf16(t, params))
    assert jnp.allclose(out, ref_match, atol=1e-2, rtol=1e-2), \
        "mismatch vs numerics-matched reference"

    # Loose sanity check against the pure-f32 (PyTorch-fidelity) reference.
    ref_f32 = reference_forward(t, params)
    rel_err = jnp.linalg.norm(out - ref_f32) / (jnp.linalg.norm(ref_f32) + 1e-12)
    assert rel_err < 5e-2, f"relative error vs f32 reference too large: {rel_err}"

    print("KERNEL_OK")
</pallas_src>

<mosaic_0001>
module attributes {stable_mosaic.version = 11 : i64} {
  func.func @_mlp_kernel(%arg0: i32, %arg1: memref<256x1xf32, #tpu.memory_space<vmem>>, %arg2: memref<1x128xf32, #tpu.memory_space<vmem>>, %arg3: memref<4x128xf32, #tpu.memory_space<vmem>>, %arg4: memref<3x128x128xbf16, #tpu.memory_space<vmem>>, %arg5: memref<128x4xbf16, #tpu.memory_space<vmem>>, %arg6: memref<1x4xf32, #tpu.memory_space<vmem>>, %arg7: memref<256x4xf32, #tpu.memory_space<vmem>>) attributes {dimension_semantics = [#tpu.dimension_semantics<parallel>], iteration_bounds = array<i64: 2>, scalar_prefetch = 0 : i64, scratch_operands = 0 : i64, tpu.core_type = #tpu.core_type<tc>, window_params = [{transform_indices = @transform_0, window_bounds = array<i64: 256, 1>}, {pipeline_mode = #tpu.pipeline_mode<synchronous>, transform_indices = @transform_1, window_bounds = array<i64: 1, 128>}, {pipeline_mode = #tpu.pipeline_mode<synchronous>, transform_indices = @transform_2, window_bounds = array<i64: 4, 128>}, {pipeline_mode = #tpu.pipeline_mode<synchronous>, transform_indices = @transform_3, window_bounds = array<i64: 3, 128, 128>}, {pipeline_mode = #tpu.pipeline_mode<synchronous>, transform_indices = @transform_4, window_bounds = array<i64: 128, 4>}, {pipeline_mode = #tpu.pipeline_mode<synchronous>, transform_indices = @transform_5, window_bounds = array<i64: 1, 4>}, {transform_indices = @transform_6, window_bounds = array<i64: 256, 4>}]} {
    %c0 = arith.constant 0 : index
    %c0_0 = arith.constant 0 : index
    %0 = vector.load %arg3[%c0, %c0_0] : memref<4x128xf32, #tpu.memory_space<vmem>>, vector<4x128xf32>
    %c0_1 = arith.constant 0 : index
    %c0_2 = arith.constant 0 : index
    %1 = vector.load %arg1[%c0_1, %c0_2] : memref<256x1xf32, #tpu.memory_space<vmem>>, vector<256x1xf32>
    %c0_3 = arith.constant 0 : index
    %c0_4 = arith.constant 0 : index
    %2 = vector.load %arg2[%c0_3, %c0_4] : memref<1x128xf32, #tpu.memory_space<vmem>>, vector<1x128xf32>
    %3 = vector.broadcast %1 : vector<256x1xf32> to vector<256x128xf32>
    %4 = vector.broadcast %2 : vector<1x128xf32> to vector<256x128xf32>
    %5 = arith.mulf %3, %4 : vector<256x128xf32>
    %6 = vector.extract_strided_slice %0 {offsets = [0, 0], sizes = [1, 128], strides = [1, 1]} : vector<4x128xf32> to vector<1x128xf32>
    %7 = vector.broadcast %6 : vector<1x128xf32> to vector<256x128xf32>
    %8 = arith.addf %5, %7 : vector<256x128xf32>
    %cst = arith.constant 0.000000e+00 : f32
    %9 = vector.broadcast %cst : f32 to vector<256x128xf32>
    %10 = arith.maximumf %8, %9 : vector<256x128xf32>
    %11 = arith.truncf %10 : vector<256x128xf32> to vector<256x128xbf16>
    %c0_5 = arith.constant 0 : index
    %c0_6 = arith.constant 0 : index
    %c0_7 = arith.constant 0 : index
    %12 = vector.load %arg4[%c0_5, %c0_6, %c0_7] : memref<3x128x128xbf16, #tpu.memory_space<vmem>>, vector<1x128x128xbf16>
    %13 = vector.shape_cast %12 : vector<1x128x128xbf16> to vector<128x128xbf16>
    %cst_8 = arith.constant dense<0.000000e+00> : vector<256x128xf32>
    %14 = tpu.matmul %11, %13, %cst_8 {dimension_numbers = #tpu.dot_dimension_numbers<[1], [0], [0], [1], [0, 0, 1, 1], [], []>} : vector<256x128xbf16>, vector<128x128xbf16>, vector<256x128xf32> -> vector<256x128xf32>
    %15 = vector.extract_strided_slice %0 {offsets = [1, 0], sizes = [1, 128], strides = [1, 1]} : vector<4x128xf32> to vector<1x128xf32>
    %16 = arith.truncf %15 : vector<1x128xf32> to vector<1x128xbf16>
    %17 = arith.truncf %14 : vector<256x128xf32> to vector<256x128xbf16>
    %18 = vector.broadcast %16 : vector<1x128xbf16> to vector<256x128xbf16>
    %19 = arith.addf %17, %18 : vector<256x128xbf16>
    %cst_9 = arith.constant 0.000000e+00 : bf16
    %20 = vector.broadcast %cst_9 : bf16 to vector<256x128xbf16>
    %21 = arith.maximumf %19, %20 : vector<256x128xbf16>
    %c1 = arith.constant 1 : index
    %c0_10 = arith.constant 0 : index
    %c0_11 = arith.constant 0 : index
    %22 = vector.load %arg4[%c1, %c0_10, %c0_11] : memref<3x128x128xbf16, #tpu.memory_space<vmem>>, vector<1x128x128xbf16>
    %23 = vector.shape_cast %22 : vector<1x128x128xbf16> to vector<128x128xbf16>
    %cst_12 = arith.constant dense<0.000000e+00> : vector<256x128xf32>
    %24 = tpu.matmul %21, %23, %cst_12 {dimension_numbers = #tpu.dot_dimension_numbers<[1], [0], [0], [1], [0, 0, 1, 1], [], []>} : vector<256x128xbf16>, vector<128x128xbf16>, vector<256x128xf32> -> vector<256x128xf32>
    %25 = vector.extract_strided_slice %0 {offsets = [2, 0], sizes = [1, 128], strides = [1, 1]} : vector<4x128xf32> to vector<1x128xf32>
    %26 = arith.truncf %25 : vector<1x128xf32> to vector<1x128xbf16>
    %27 = arith.truncf %24 : vector<256x128xf32> to vector<256x128xbf16>
    %28 = vector.broadcast %26 : vector<1x128xbf16> to vector<256x128xbf16>
    %29 = arith.addf %27, %28 : vector<256x128xbf16>
    %cst_13 = arith.constant 0.000000e+00 : bf16
    %30 = vector.broadcast %cst_13 : bf16 to vector<256x128xbf16>
    %31 = arith.maximumf %29, %30 : vector<256x128xbf16>
    %c2 = arith.constant 2 : index
    %c0_14 = arith.constant 0 : index
    %c0_15 = arith.constant 0 : index
    %32 = vector.load %arg4[%c2, %c0_14, %c0_15] : memref<3x128x128xbf16, #tpu.memory_space<vmem>>, vector<1x128x128xbf16>
    %33 = vector.shape_cast %32 : vector<1x128x128xbf16> to vector<128x128xbf16>
    %cst_16 = arith.constant dense<0.000000e+00> : vector<256x128xf32>
    %34 = tpu.matmul %31, %33, %cst_16 {dimension_numbers = #tpu.dot_dimension_numbers<[1], [0], [0], [1], [0, 0, 1, 1], [], []>} : vector<256x128xbf16>, vector<128x128xbf16>, vector<256x128xf32> -> vector<256x128xf32>
    %35 = vector.extract_strided_slice %0 {offsets = [3, 0], sizes = [1, 128], strides = [1, 1]} : vector<4x128xf32> to vector<1x128xf32>
    %36 = arith.truncf %35 : vector<1x128xf32> to vector<1x128xbf16>
    %37 = arith.truncf %34 : vector<256x128xf32> to vector<256x128xbf16>
    %38 = vector.broadcast %36 : vector<1x128xbf16> to vector<256x128xbf16>
    %39 = arith.addf %37, %38 : vector<256x128xbf16>
    %cst_17 = arith.constant 0.000000e+00 : bf16
    %40 = vector.broadcast %cst_17 : bf16 to vector<256x128xbf16>
    %41 = arith.maximumf %39, %40 : vector<256x128xbf16>
    %c0_18 = arith.constant 0 : index
    %c0_19 = arith.constant 0 : index
    %42 = vector.load %arg5[%c0_18, %c0_19] : memref<128x4xbf16, #tpu.memory_space<vmem>>, vector<128x4xbf16>
    %cst_20 = arith.constant dense<0.000000e+00> : vector<256x4xf32>
    %43 = tpu.matmul %41, %42, %cst_20 {dimension_numbers = #tpu.dot_dimension_numbers<[1], [0], [0], [1], [0, 0, 1, 1], [], []>} : vector<256x128xbf16>, vector<128x4xbf16>, vector<256x4xf32> -> vector<256x4xf32>
    %c0_21 = arith.constant 0 : index
    %c0_22 = arith.constant 0 : index
    %44 = vector.load %arg6[%c0_21, %c0_22] : memref<1x4xf32, #tpu.memory_space<vmem>>, vector<1x4xf32>
    %45 = vector.broadcast %44 : vector<1x4xf32> to vector<256x4xf32>
    %46 = arith.addf %43, %45 : vector<256x4xf32>
    %c0_23 = arith.constant 0 : index
    %c0_24 = arith.constant 0 : index
    %47 = vector.load %arg7[%c0_23, %c0_24] : memref<256x4xf32, #tpu.memory_space<vmem>>, vector<256x4xf32>
    tpu.vector_store %arg7[%c0_23, %c0_24], %46 {strides = array<i32>} : memref<256x4xf32, #tpu.memory_space<vmem>>, vector<256x4xf32>,
    return
  }
  func.func @transform_0(%arg0: i32) -> (i32, i32) {
    %c0_i32 = arith.constant 0 : i32
    %c0_i32_0 = arith.constant 0 : i32
    return %arg0, %c0_i32 : i32, i32
  }
  func.func @transform_1(%arg0: i32) -> (i32, i32) {
    %c0_i32 = arith.constant 0 : i32
    %c0_i32_0 = arith.constant 0 : i32
    %c0_i32_1 = arith.constant 0 : i32
    return %c0_i32, %c0_i32_0 : i32, i32
  }
  func.func @transform_2(%arg0: i32) -> (i32, i32) {
    %c0_i32 = arith.constant 0 : i32
    %c0_i32_0 = arith.constant 0 : i32
    %c0_i32_1 = arith.constant 0 : i32
    return %c0_i32, %c0_i32_0 : i32, i32
  }
  func.func @transform_3(%arg0: i32) -> (i32, i32, i32) {
    %c0_i32 = arith.constant 0 : i32
    %c0_i32_0 = arith.constant 0 : i32
    %c0_i32_1 = arith.constant 0 : i32
    %c0_i32_2 = arith.constant 0 : i32
    return %c0_i32, %c0_i32_0, %c0_i32_1 : i32, i32, i32
  }
  func.func @transform_4(%arg0: i32) -> (i32, i32) {
    %c0_i32 = arith.constant 0 : i32
    %c0_i32_0 = arith.constant 0 : i32
    %c0_i32_1 = arith.constant 0 : i32
    return %c0_i32, %c0_i32_0 : i32, i32
  }
  func.func @transform_5(%arg0: i32) -> (i32, i32) {
    %c0_i32 = arith.constant 0 : i32
    %c0_i32_0 = arith.constant 0 : i32
    %c0_i32_1 = arith.constant 0 : i32
    return %c0_i32, %c0_i32_0 : i32, i32
  }
  func.func @transform_6(%arg0: i32) -> (i32, i32) {
    %c0_i32 = arith.constant 0 : i32
    %c0_i32_0 = arith.constant 0 : i32
    return %arg0, %c0_i32 : i32, i32
  }
}

</mosaic_0001>

<bundles_post_ra>
// kernel: tpu_custom_call.1
= control target key start
LH: loop header
LB: loop body
LE: loop exit
PB: predicated region body
PF: predicated region fallthrough
CT: control target
= control target key end

     0   :  { %s2170_s21 = smov 0   ;;  %s2617_s0 = inlined_call_operand.vmem [shape: f32[512,1], index: 0, kind: input, shape index: {}]   ;;  %s2618_s1 = inlined_call_operand.vmem [shape: f32[1,128], index: 1, kind: input, shape index: {}]   ;;  %s2619_s2 = inlined_call_operand.vmem [shape: f32[4,128], index: 2, kind: input, shape index: {}]   ;;  %s2620_s3 = inlined_call_operand.vmem [shape: bf16[3,128,128], index: 3, kind: input, shape index: {}]   ;;  %s2621_s4 = inlined_call_operand.vmem [shape: bf16[128,4], index: 4, kind: input, shape index: {}]   ;;  %s2622_s5 = inlined_call_operand.vmem [shape: f32[1,4], index: 5, kind: input, shape index: {}]   ;;  %s2623_s6 = inlined_call_operand.vmem [shape: f32[512,4], index: 6, kind: output, shape index: {}]  }
   0x1 LB: > { %s1909_s22 = sadd.s32 4294967295, %s2132_s21   ;;  %p1913_p0 = scmp.ge.s32.totalorder %s2132_s21, 1  ;;  %s2132_s21 = sphi %s2170_s21, %s16_s21  }
   0x2   : > { %p213_p1 = scmp.lt.s32.totalorder %s2132_s21, 3 }
   0x4   : > { %p214_p2 = pnand %p1913_p0, %p213_p1 }
   0x5   : > { %s1914_s23 = sshll.u32 (!%p214_p2), %s1909_s22, 5 }
   0x6   : > { %217 = sbr.rel (%p214_p2) target bundleno = 968 (0x3c8), region = 44  ;;  %p244_p3 = scmp.lt.s32.totalorder (!%p214_p2), %s1914_s23, 63 }
   0xb   : > { %v2134_v0 = vmov 0   ;;  %s2625_s23 = smov (!%p244_p3, %s1914_s23), 63  ;;  %v2087_v28 = vld [vmem:[%s2620_s3 + $0x38] sm:$0xff]  ;;  %v2086_v32 = vld [vmem:[%s2620_s3 + $0x30] sm:$0xff]  ;;  %v2085_v33 = vld [vmem:[%s2620_s3 + $0x28] sm:$0xff]  ;;  %vm1820_vm0 = vcmask 31744  }
   0xc   : > { %2123 = vset.pattern.permute.xlu2 %v2134_v0  ;;  %2122 = vset.pattern.permute.xlu1 %v2134_v0  ;;  %s1915_s24 = sshll.u32 %s2625_s23, 3  ;;  %v2084_v36 = vld [vmem:[%s2620_s3 + $0x20] sm:$0xff]  ;;  %v2083_v37 = vld [vmem:[%s2620_s3 + $0x18] sm:$0xff]  ;;  %v2082_v38 = vld [vmem:[%s2620_s3 + $0x10] sm:$0xff] }
   0xd   : > { %2121 = vset.pattern.permute.xlu0 %v2134_v0  ;;  %s2186_s27 = scalar_lea.vmem %s2617_s0, %s1915_s24  ;;  %629 = vmatpush.bf16.msra.mxu0 %v2087_v28  ;;  %v2081_v39 = vld [vmem:[%s2620_s3 + $0x8] sm:$0xff]  ;;  %v2080_v40 = vld [vmem:[%s2620_s3] sm:$0xff]  ;;  %s2502_s13 = scalar_lea.vmem %s2623_s6, %s1915_s24 }
   0xe   : > { %v260_v1 = vld [vmem:[%s2186_s27 + $0x20] sm:$0xff]  ;;  %v258_v2 = vld [vmem:[%s2186_s27 + $0x10] sm:$0xff]  ;;  %v261_v4 = vld [vmem:[%s2186_s27 + $0x28] sm:$0xff] }
   0xf   : > { %v256_v3 = vld [vmem:[%s2186_s27] sm:$0xff]  ;;  %311 = vperm.xlu2 %2123, %v260_v1   ;;  %301 = vperm.xlu1 %2122, %v258_v2   ;;  %v259_v5 = vld [vmem:[%s2186_s27 + $0x18] sm:$0xff]  ;;  %v257_v6 = vld [vmem:[%s2186_s27 + $0x8] sm:$0xff] }
  0x10   : > { %291 = vperm.xlu0 %2121, %v256_v3   ;;  %v264_v7 = vld [vmem:[%s2186_s27 + $0x40] sm:$0xff]  ;;  %v263_v8 = vld [vmem:[%s2186_s27 + $0x38] sm:$0xff]  ;;  %v262_v9 = vld [vmem:[%s2186_s27 + $0x30] sm:$0xff] }
  0x11   : > { %v267_v10 = vld [vmem:[%s2186_s27 + $0x58] sm:$0xff]  ;;  %v266_v11 = vld [vmem:[%s2186_s27 + $0x50] sm:$0xff]  ;;  %v265_v12 = vld [vmem:[%s2186_s27 + $0x48] sm:$0xff]  ;;  %630 = vmatpush.bf16.msra.mxu0 %v2086_v32 }
  0x12   : > { %v270_v13 = vld [vmem:[%s2186_s27 + $0x70] sm:$0xff]  ;;  %v269_v14 = vld [vmem:[%s2186_s27 + $0x68] sm:$0xff]  ;;  %v268_v15 = vld [vmem:[%s2186_s27 + $0x60] sm:$0xff] }
  0x13   : > { %v273_v16 = vld [vmem:[%s2186_s27 + $0x88] sm:$0xff]  ;;  %v272_v17 = vld [vmem:[%s2186_s27 + $0x80] sm:$0xff]  ;;  %v271_v18 = vld [vmem:[%s2186_s27 + $0x78] sm:$0xff] }
  0x14   : > { %v276_v19 = vld [vmem:[%s2186_s27 + $0xa0] sm:$0xff]  ;;  %v275_v20 = vld [vmem:[%s2186_s27 + $0x98] sm:$0xff]  ;;  %v274_v21 = vld [vmem:[%s2186_s27 + $0x90] sm:$0xff] }
  0x15   : > { %v279_v22 = vld [vmem:[%s2186_s27 + $0xb8] sm:$0xff]  ;;  %v278_v23 = vld [vmem:[%s2186_s27 + $0xb0] sm:$0xff]  ;;  %v277_v24 = vld [vmem:[%s2186_s27 + $0xa8] sm:$0xff]  ;;  %631 = vmatpush.bf16.msra.mxu0 %v2085_v33 }
  0x16   : > { %v282_v25 = vld [vmem:[%s2186_s27 + $0xd0] sm:$0xff]  ;;  %v281_v26 = vld [vmem:[%s2186_s27 + $0xc8] sm:$0xff]  ;;  %v280_v27 = vld [vmem:[%s2186_s27 + $0xc0] sm:$0xff] }
  0x17   : > { %316 = vperm.xlu2 %2123, %v261_v4   ;;  %306 = vperm.xlu1 %2122, %v259_v5   ;;  %v285_v29 = vld [vmem:[%s2186_s27 + $0xe8] sm:$0xff]  ;;  %v284_v30 = vld [vmem:[%s2186_s27 + $0xe0] sm:$0xff]  ;;  %v283_v31 = vld [vmem:[%s2186_s27 + $0xd8] sm:$0xff] }
  0x18   : > { %296 = vperm.xlu0 %2121, %v257_v6   ;;  %v287_v34 = vld [vmem:[%s2186_s27 + $0xf8] sm:$0xff]  ;;  %v286_v35 = vld [vmem:[%s2186_s27 + $0xf0] sm:$0xff]  ;;  %v2247_v42 = vld [vmem:[%s2618_s1] ss:$0 sm:$0xff] }
  0x19   : > { %632 = vmatpush.bf16.msra.mxu0 %v2084_v36  ;;  %v2252_v43 = vld [vmem:[%s2619_s2] sm:$0xf]  ;;  %v2095_v36 = vld [vmem:[%s2620_s3 + $0x78] sm:$0xff] }
  0x1a   : > { %v2255_v44 = vperm.slane %v2252_v43, 0  ;;  %998 = vmatpush.bf16.msra.mxu1 %v2095_v36 }
  0x1d   : > { %633 = vmatpush.bf16.msra.mxu0 %v2083_v37  ;;  %v2094_v37 = vld [vmem:[%s2620_s3 + $0x70] sm:$0xff] }
  0x1e   : > { %999 = vmatpush.bf16.msra.mxu1 %v2094_v37 }
  0x1f   : > { %331 = vperm.xlu2 %2123, %v264_v7   ;;  %326 = vperm.xlu1 %2122, %v263_v8  }
  0x20   : > { %321 = vperm.xlu0 %2121, %v262_v9  }
  0x21   : > { %634 = vmatpush.bf16.msra.mxu0 %v2082_v38 }
  0x25   : > { %635 = vmatpush.bf16.msra.mxu0 %v2081_v39 }
  0x27   : > { %346 = vperm.xlu2 %2123, %v267_v10   ;;  %341 = vperm.xlu1 %2122, %v266_v11  }
  0x28   : > { %336 = vperm.xlu0 %2121, %v265_v12  }
  0x29   : > { %636 = vmatpush.bf16.msra.mxu0 %v2080_v40  ;;  %v2093_v40 = vld [vmem:[%s2620_s3 + $0x68] sm:$0xff] }
  0x2a   : > { %1000 = vmatpush.bf16.msra.mxu1 %v2093_v40 }
  0x2f   : > { %361 = vperm.xlu2 %2123, %v270_v13   ;;  %356 = vperm.xlu1 %2122, %v269_v14  }
  0x30   : > { %351 = vperm.xlu0 %2121, %v268_v15  }
  0x37   : > { %376 = vperm.xlu2 %2123, %v273_v16   ;;  %371 = vperm.xlu1 %2122, %v272_v17  }
  0x38   : > { %366 = vperm.xlu0 %2121, %v271_v18  }
  0x3f   : > { %391 = vperm.xlu2 %2123, %v276_v19   ;;  %386 = vperm.xlu1 %2122, %v275_v20  }
  0x40   : > { %381 = vperm.xlu0 %2121, %v274_v21  }
  0x47   : > { %406 = vperm.xlu2 %2123, %v279_v22   ;;  %401 = vperm.xlu1 %2122, %v278_v23  }
  0x48   : > { %396 = vperm.xlu0 %2121, %v277_v24  }
  0x4f   : > { %421 = vperm.xlu2 %2123, %v282_v25   ;;  %416 = vperm.xlu1 %2122, %v281_v26  }
  0x50   : > { %411 = vperm.xlu0 %2121, %v280_v27  }
  0x57   : > { %436 = vperm.xlu2 %2123, %v285_v29   ;;  %431 = vperm.xlu1 %2122, %v284_v30  }
  0x58   : > { %426 = vperm.xlu0 %2121, %v283_v31  }
  0x5f   : > { %446 = vperm.xlu1 %2122, %v287_v34  }
  0x60   : > { %441 = vperm.xlu0 %2121, %v286_v35  }
  0x69   : > { %v312_v59 = vpop.permute.xlu2 %311 }
  0x6a   : > { %v456_v0 = vmul.f32 %v2247_v42, %v312_v59 }
  0x6c   : > { %v489_v2 = vadd.f32 %v2255_v44, %v456_v0 }
  0x6e   : > { %v521_v4 = vmax.f32 %v489_v2, 0.0 }
  0x71   : > { %v317_v63 = vpop.permute.xlu2 %316 }
  0x72   : > { %v457_v1 = vmul.f32 %v2247_v42, %v317_v63 }
  0x74   : > { %v490_v3 = vadd.f32 %v2255_v44, %v457_v1 }
  0x76   : > { %v522_v5 = vmax.f32 %v490_v3, 0.0  ;;  %v2317_v3 = vpack.c.bf16 %v2252_v43, %v2252_v43 }
  0x78   : > { %v551_v6 = vpack.c.bf16 %v522_v5, %v521_v4 }
  0x79   : > { %v332_v17 = vpop.permute.xlu2 %331 }
  0x7a   : > { %v460_v18 = vmul.f32 %v2247_v42, %v332_v17 }
  0x7c   : > { %v493_v20 = vadd.f32 %v2255_v44, %v460_v18 }
  0x7e   : > { %v525_v22 = vmax.f32 %v493_v20, 0.0 }
  0x81   : > { %v302_v46 = vpop.permute.xlu1 %301  ;;  %v347_v26 = vpop.permute.xlu2 %346 }
  0x82   : > { %v292_v41 = vpop.permute.xlu0 %291  ;;  %v454_v55 = vmul.f32 %v2247_v42, %v302_v46  ;;  %v463_v27 = vmul.f32 %v2247_v42, %v347_v26 }
  0x83   : > { %v452_v45 = vmul.f32 %v2247_v42, %v292_v41 }
  0x84   : > { %v487_v57 = vadd.f32 %v2255_v44, %v454_v55  ;;  %v496_v29 = vadd.f32 %v2255_v44, %v463_v27 }
  0x85   : > { %v485_v48 = vadd.f32 %v2255_v44, %v452_v45 }
  0x86   : > { %v519_v60 = vmax.f32 %v487_v57, 0.0  ;;  %v528_v31 = vmax.f32 %v496_v29, 0.0  ;;  %v2089_v57 = vld [vmem:[%s2620_s3 + $0x48] sm:$0xff] }
  0x87   : > { %v517_v51 = vmax.f32 %v485_v48, 0.0  ;;  %v2092_v48 = vld [vmem:[%s2620_s3 + $0x60] sm:$0xff] }
  0x88   : > { %1001 = vmatpush.bf16.msra.mxu1 %v2092_v48 }
  0x89   : > { %v307_v54 = vpop.permute.xlu1 %306 }
  0x8a   : > { %v297_v47 = vpop.permute.xlu0 %296  ;;  %v455_v56 = vmul.f32 %v2247_v42, %v307_v54  ;;  %v2090_v54 = vld [vmem:[%s2620_s3 + $0x50] sm:$0xff] }
  0x8b   : > { %v453_v49 = vmul.f32 %v2247_v42, %v297_v47 }
  0x8c   : > { %v488_v58 = vadd.f32 %v2255_v44, %v455_v56 }
  0x8d   : > { %v486_v50 = vadd.f32 %v2255_v44, %v453_v49 }
  0x8e   : > { %v520_v61 = vmax.f32 %v488_v58, 0.0 }
  0x8f   : > { %v518_v52 = vmax.f32 %v486_v50, 0.0 }
  0x90   : > { %v550_v62 = vpack.c.bf16 %v520_v61, %v519_v60  ;;  %v2088_v60 = vld [vmem:[%s2620_s3 + $0x40] sm:$0xff] }
  0x91   : > { %v549_v53 = vpack.c.bf16 %v518_v52, %v517_v51  ;;  %v327_v7 = vpop.permute.xlu1 %326  ;;  %v2091_v51 = vld [vmem:[%s2620_s3 + $0x58] sm:$0xff] }
  0x92   : > { %v322_v8 = vpop.permute.xlu0 %321  ;;  %v459_v9 = vmul.f32 %v2247_v42, %v327_v7  ;;  %1002 = vmatpush.bf16.msra.mxu1 %v2091_v51 }
  0x93   : > { %637 = vmatmul.bf16.vlgmr.msra.gmra.mxu0 %v549_v53  ;;  %v458_v10 = vmul.f32 %v2247_v42, %v322_v8  ;;  %v362_v53 = vpop.permute.xlu2 %361 }
  0x94   : > { %v492_v11 = vadd.f32 %v2255_v44, %v459_v9  ;;  %v466_v55 = vmul.f32 %v2247_v42, %v362_v53 }
  0x95   : > { %v491_v12 = vadd.f32 %v2255_v44, %v458_v10 }
  0x96   : > { %v524_v13 = vmax.f32 %v492_v11, 0.0  ;;  %1003 = vmatpush.bf16.msra.mxu1 %v2090_v54  ;;  %v499_v58 = vadd.f32 %v2255_v44, %v466_v55 }
  0x97   : > { %v523_v14 = vmax.f32 %v491_v12, 0.0 }
  0x98   : > { %v531_v61 = vmax.f32 %v499_v58, 0.0 }
  0x99   : > { %v552_v15 = vpack.c.bf16 %v524_v13, %v523_v14  ;;  %v342_v25 = vpop.permute.xlu1 %341 }
  0x9a   : > { %v337_v16 = vpop.permute.xlu0 %336  ;;  %v462_v28 = vmul.f32 %v2247_v42, %v342_v25  ;;  %1004 = vmatpush.bf16.msra.mxu1 %v2089_v57 }
  0x9b   : > { %v461_v19 = vmul.f32 %v2247_v42, %v337_v16  ;;  %v377_v1 = vpop.permute.xlu2 %376 }
  0x9c   : > { %v495_v30 = vadd.f32 %v2255_v44, %v462_v28  ;;  %v469_v2 = vmul.f32 %v2247_v42, %v377_v1 }
  0x9d   : > { %v494_v21 = vadd.f32 %v2255_v44, %v461_v19 }
  0x9e   : > { %v527_v32 = vmax.f32 %v495_v30, 0.0  ;;  %1005 = vmatpush.bf16.msra.mxu1 %v2088_v60  ;;  %v502_v5 = vadd.f32 %v2255_v44, %v469_v2 }
  0x9f   : > { %v526_v23 = vmax.f32 %v494_v21, 0.0 }
  0xa0   : > { %v554_v33 = vpack.c.bf16 %v528_v31, %v527_v32  ;;  %v534_v8 = vmax.f32 %v502_v5, 0.0 }
  0xa1   : > { %v553_v24 = vpack.c.bf16 %v526_v23, %v525_v22  ;;  %v357_v34 = vpop.permute.xlu1 %356 }
  0xa2   : > { %v352_v35 = vpop.permute.xlu0 %351  ;;  %v465_v38 = vmul.f32 %v2247_v42, %v357_v34 }
  0xa3   : > { %642 = vmatmul.bf16.gmra.mxu0 %v550_v62  ;;  %v464_v39 = vmul.f32 %v2247_v42, %v352_v35  ;;  %v392_v36 = vpop.permute.xlu2 %391 }
  0xa4   : > { %v498_v41 = vadd.f32 %v2255_v44, %v465_v38  ;;  %v472_v37 = vmul.f32 %v2247_v42, %v392_v36 }
  0xa5   : > { %v497_v45 = vadd.f32 %v2255_v44, %v464_v39 }
  0xa6   : > { %v530_v46 = vmax.f32 %v498_v41, 0.0 }
  0xa7   : > { %v529_v47 = vmax.f32 %v497_v45, 0.0  ;;  %v505_v45 = vadd.f32 %v2255_v44, %v472_v37 }
  0xa9   : > { %v555_v49 = vpack.c.bf16 %v530_v46, %v529_v47  ;;  %v372_v63 = vpop.permute.xlu1 %371 }
  0xaa   : > { %v367_v50 = vpop.permute.xlu0 %366  ;;  %v468_v0 = vmul.f32 %v2247_v42, %v372_v63 }
  0xab   : > { %v467_v52 = vmul.f32 %v2247_v42, %v367_v50  ;;  %v537_v50 = vmax.f32 %v505_v45, 0.0  ;;  %v407_v58 = vpop.permute.xlu2 %406 }
  0xac   : > { %v501_v4 = vadd.f32 %v2255_v44, %v468_v0  ;;  %v475_v60 = vmul.f32 %v2247_v42, %v407_v58 }
  0xad   : > { %v500_v56 = vadd.f32 %v2255_v44, %v467_v52 }
  0xae   : > { %v533_v7 = vmax.f32 %v501_v4, 0.0  ;;  %v508_v1 = vadd.f32 %v2255_v44, %v475_v60 }
  0xaf   : > { %v532_v59 = vmax.f32 %v500_v56, 0.0 }
  0xb0   : > { %v557_v11 = vpack.c.bf16 %v534_v8, %v533_v7  ;;  %v540_v7 = vmax.f32 %v508_v1, 0.0 }
  0xb1   : > { %v556_v62 = vpack.c.bf16 %v532_v59, %v531_v61  ;;  %v387_v12 = vpop.permute.xlu1 %386 }
  0xb2   : > { %v382_v13 = vpop.permute.xlu0 %381  ;;  %v471_v43 = vmul.f32 %v2247_v42, %v387_v12 }
  0xb3   : > { %647 = vmatmul.bf16.gmra.mxu0 %v551_v6  ;;  %v752_v6 = vshrl.u32 %v2317_v3, 16  ;;  %v470_v16 = vmul.f32 %v2247_v42, %v382_v13  ;;  %v422_v36 = vpop.permute.xlu2 %421 }
  0xb4   : > { %v504_v20 = vadd.f32 %v2255_v44, %v471_v43 }
  0xb5   : > { %v2322_v9 = vpack.i.b16 %v752_v6, %v752_v6  ;;  %v503_v21 = vadd.f32 %v2255_v44, %v470_v16 }
  0xb6   : > { %v536_v25 = vmax.f32 %v504_v20, 0.0 }
  0xb7   : > { %v535_v26 = vmax.f32 %v503_v21, 0.0 }
  0xb9   : > { %v558_v31 = vpack.c.bf16 %v536_v25, %v535_v26  ;;  %v402_v56 = vpop.permute.xlu1 %401 }
  0xba   : > { %v474_v59 = vmul.f32 %v2247_v42, %v402_v56 }
  0xbc   : > { %v507_v63 = vadd.f32 %v2255_v44, %v474_v59  ;;  %v437_v59 = vpop.permute.xlu2 %436 }
  0xbe   : > { %v539_v5 = vmax.f32 %v507_v63, 0.0 }
  0xc0   : > { %v560_v12 = vpack.c.bf16 %v540_v7, %v539_v5 }
  0xc3   : > { %652 = vmatmul.bf16.gmra.mxu0 %v552_v15  ;;  %v755_v15 = vperm.slane %v2322_v9, 0 }
  0xc5   : > { %v2327_v18 = vunpack.c.l.bf16 %v755_v15 }
  0xd3   : > { %657 = vmatmul.bf16.gmra.mxu0 %v553_v24 }
  0xe3   : > { %662 = vmatmul.bf16.gmra.mxu0 %v554_v33  ;;  %v397_v33 = vpop.permute.xlu0 %396 }
  0xe4   : > { %v473_v35 = vmul.f32 %v2247_v42, %v397_v33 }
  0xe6   : > { %v506_v40 = vadd.f32 %v2255_v44, %v473_v35 }
  0xe8   : > { %v538_v48 = vmax.f32 %v506_v40, 0.0 }
  0xea   : > { %v559_v54 = vpack.c.bf16 %v538_v48, %v537_v50 }
  0xeb   : > { %v412_v15 = vpop.permute.xlu0 %411 }
  0xf3   : > { %667 = vmatmul.bf16.gmra.mxu0 %v555_v49 }
 0x103   : > { %672 = vmatmul.bf16.gmra.mxu0 %v556_v62 }
 0x110   : > { %v638_v10 = vpop.f32.mrf.mxu0 }
 0x111   : > { %v719_v14 = vpack.c.bf16 %v638_v10, %v638_v10 }
 0x113   : > { %677 = vmatmul.bf16.gmra.mxu0 %v557_v11  ;;  %v756_v17 = vunpack.c.l.bf16 %v719_v14  ;;  %v417_v14 = vpop.permute.xlu1 %416 }
 0x114   : > { %v477_v16 = vmul.f32 %v2247_v42, %v417_v14 }
 0x115   : > { %v789_v23 = vadd.f32 %v2327_v18, %v756_v17  ;;  %v476_v17 = vmul.f32 %v2247_v42, %v412_v15 }
 0x116   : > { %v510_v21 = vadd.f32 %v2255_v44, %v477_v16  ;;  %v2103_v16 = vld [vmem:[%s2620_s3 + $0xb8] sm:$0xff] }
 0x117   : > { %v885_v28 = vmax.f32 %v789_v23, 0.0  ;;  %1364 = vmatpush.bf16.msra.mxu2 %v2103_v16 }
 0x118   : > { %v640_v19 = vpop.f32.mrf.mxu0  ;;  %v542_v26 = vmax.f32 %v510_v21, 0.0  ;;  %v2102_v21 = vld [vmem:[%s2620_s3 + $0xb0] sm:$0xff] }
 0x119   : > { %v720_v22 = vpack.c.bf16 %v640_v19, %v640_v19 }
 0x11b   : > { %v757_v24 = vunpack.c.l.bf16 %v720_v22  ;;  %v509_v22 = vadd.f32 %v2255_v44, %v476_v17  ;;  %1365 = vmatpush.bf16.msra.mxu2 %v2102_v21 }
 0x11d   : > { %v790_v27 = vadd.f32 %v2327_v18, %v757_v24 }
 0x11f   : > { %v886_v29 = vmax.f32 %v790_v27, 0.0  ;;  %v541_v27 = vmax.f32 %v509_v22, 0.0 }
 0x120   : > { %v643_v30 = vpop.f32.mrf.mxu0 }
 0x121   : > { %v917_v32 = vpack.c.bf16 %v886_v29, %v885_v28  ;;  %v721_v34 = vpack.c.bf16 %v643_v30, %v643_v30 }
 0x123   : > { %682 = vmatmul.bf16.gmra.mxu0 %v558_v31  ;;  %1006 = vmatmul.bf16.vlgmr.msra.gmra.mxu1 %v917_v32  ;;  %v758_v38 = vunpack.c.l.bf16 %v721_v34  ;;  %v561_v32 = vpack.c.bf16 %v542_v26, %v541_v27  ;;  %v427_v34 = vpop.permute.xlu0 %426  ;;  %v2101_v27 = vld [vmem:[%s2620_s3 + $0xa8] sm:$0xff] }
 0x124   : > { %v479_v37 = vmul.f32 %v2247_v42, %v427_v34  ;;  %1366 = vmatpush.bf16.msra.mxu2 %v2101_v27 }
 0x125   : > { %v791_v46 = vadd.f32 %v2327_v18, %v758_v38  ;;  %v478_v38 = vmul.f32 %v2247_v42, %v422_v36 }
 0x127   : > { %v887_v51 = vmax.f32 %v791_v46, 0.0  ;;  %v511_v46 = vadd.f32 %v2255_v44, %v478_v38 }
 0x128   : > { %v645_v39 = vpop.f32.mrf.mxu0 }
 0x129   : > { %v722_v41 = vpack.c.bf16 %v645_v39, %v645_v39 }
 0x12b   : > { %v759_v47 = vunpack.c.l.bf16 %v722_v41  ;;  %v512_v41 = vadd.f32 %v2255_v44, %v479_v37  ;;  %v2099_v37 = vld [vmem:[%s2620_s3 + $0x98] sm:$0xff] }
 0x12d   : > { %v792_v49 = vadd.f32 %v2327_v18, %v759_v47 }
 0x12f   : > { %v888_v52 = vmax.f32 %v792_v49, 0.0  ;;  %v544_v49 = vmax.f32 %v512_v41, 0.0 }
 0x130   : > { %v648_v53 = vpop.f32.mrf.mxu0 }
 0x131   : > { %v918_v55 = vpack.c.bf16 %v888_v52, %v887_v51  ;;  %v723_v57 = vpack.c.bf16 %v648_v53, %v648_v53  ;;  %v543_v51 = vmax.f32 %v511_v46, 0.0  ;;  %v2097_v46 = vld [vmem:[%s2620_s3 + $0x88] sm:$0xff] }
 0x133   : > { %687 = vmatmul.bf16.gmra.mxu0 %v559_v54  ;;  %1011 = vmatmul.bf16.gmra.mxu1 %v918_v55  ;;  %v760_v61 = vunpack.c.l.bf16 %v723_v57  ;;  %v562_v55 = vpack.c.bf16 %v544_v49, %v543_v51  ;;  %v432_v57 = vpop.permute.xlu1 %431 }
 0x134   : > { %v480_v60 = vmul.f32 %v2247_v42, %v432_v57 }
 0x135   : > { %v793_v2 = vadd.f32 %v2327_v18, %v760_v61  ;;  %v481_v61 = vmul.f32 %v2247_v42, %v437_v59 }
 0x137   : > { %v889_v8 = vmax.f32 %v793_v2, 0.0  ;;  %v514_v2 = vadd.f32 %v2255_v44, %v481_v61 }
 0x138   : > { %v650_v62 = vpop.f32.mrf.mxu0 }
 0x139   : > { %v724_v0 = vpack.c.bf16 %v650_v62, %v650_v62 }
 0x13b   : > { %v761_v4 = vunpack.c.l.bf16 %v724_v0  ;;  %v513_v0 = vadd.f32 %v2255_v44, %v480_v60  ;;  %v447_v15 = vpop.permute.xlu1 %446 }
 0x13d   : > { %v794_v6 = vadd.f32 %v2327_v18, %v761_v4 }
 0x13f   : > { %v890_v10 = vmax.f32 %v794_v6, 0.0  ;;  %v545_v6 = vmax.f32 %v513_v0, 0.0 }
 0x140   : > { %v653_v11 = vpop.f32.mrf.mxu0 }
 0x141   : > { %v919_v13 = vpack.c.bf16 %v890_v10, %v889_v8  ;;  %v725_v43 = vpack.c.bf16 %v653_v11, %v653_v11  ;;  %v546_v8 = vmax.f32 %v514_v2, 0.0 }
 0x143   : > { %692 = vmatmul.bf16.gmra.mxu0 %v560_v12  ;;  %1016 = vmatmul.bf16.gmra.mxu1 %v919_v13  ;;  %v762_v19 = vunpack.c.l.bf16 %v725_v43  ;;  %v563_v13 = vpack.c.bf16 %v546_v8, %v545_v6  ;;  %v442_v43 = vpop.permute.xlu0 %441 }
 0x145   : > { %v795_v24 = vadd.f32 %v2327_v18, %v762_v19  ;;  %v483_v19 = vmul.f32 %v2247_v42, %v447_v15 }
 0x147   : > { %v891_v29 = vmax.f32 %v795_v24, 0.0  ;;  %v516_v24 = vadd.f32 %v2255_v44, %v483_v19 }
 0x148   : > { %v655_v20 = vpop.f32.mrf.mxu0 }
 0x149   : > { %v726_v23 = vpack.c.bf16 %v655_v20, %v655_v20  ;;  %v482_v20 = vmul.f32 %v2247_v42, %v442_v43  ;;  %v548_v42 = vmax.f32 %v516_v24, 0.0 }
 0x14b   : > { %v763_v25 = vunpack.c.l.bf16 %v726_v23 }
 0x14d   : > { %v796_v28 = vadd.f32 %v2327_v18, %v763_v25  ;;  %v515_v25 = vadd.f32 %v2255_v44, %v482_v20 }
 0x14f   : > { %v892_v30 = vmax.f32 %v796_v28, 0.0 }
 0x150   : > { %v658_v31 = vpop.f32.mrf.mxu0 }
 0x151   : > { %v920_v33 = vpack.c.bf16 %v892_v30, %v891_v29  ;;  %v727_v35 = vpack.c.bf16 %v658_v31, %v658_v31  ;;  %v547_v30 = vmax.f32 %v515_v25, 0.0 }
 0x153   : > { %697 = vmatmul.bf16.gmra.mxu0 %v561_v32  ;;  %1021 = vmatmul.bf16.gmra.mxu1 %v920_v33  ;;  %v764_v39 = vunpack.c.l.bf16 %v727_v35  ;;  %v2100_v32 = vld [vmem:[%s2620_s3 + $0xa0] sm:$0xff]  ;;  %v564_v35 = vpack.c.bf16 %v548_v42, %v547_v30 }
 0x154   : > { %1367 = vmatpush.bf16.msra.mxu2 %v2100_v32 }
 0x155   : > { %v797_v47 = vadd.f32 %v2327_v18, %v764_v39  ;;  %v2098_v39 = vld [vmem:[%s2620_s3 + $0x90] sm:$0xff] }
 0x157   : > { %v893_v52 = vmax.f32 %v797_v47, 0.0 }
 0x158   : > { %v660_v40 = vpop.f32.mrf.mxu0  ;;  %1368 = vmatpush.bf16.msra.mxu2 %v2099_v37 }
 0x159   : > { %v728_v45 = vpack.c.bf16 %v660_v40, %v660_v40 }
 0x15b   : > { %v765_v48 = vunpack.c.l.bf16 %v728_v45 }
 0x15c   : > { %1369 = vmatpush.bf16.msra.mxu2 %v2098_v39 }
 0x15d   : > { %v798_v50 = vadd.f32 %v2327_v18, %v765_v48 }
 0x15f   : > { %v894_v53 = vmax.f32 %v798_v50, 0.0  ;;  %v2096_v50 = vld [vmem:[%s2620_s3 + $0x80] sm:$0xff] }
 0x160   : > { %v663_v54 = vpop.f32.mrf.mxu0  ;;  %1370 = vmatpush.bf16.msra.mxu2 %v2097_v46 }
 0x161   : > { %v921_v56 = vpack.c.bf16 %v894_v53, %v893_v52  ;;  %v729_v58 = vpack.c.bf16 %v663_v54, %v663_v54 }
 0x163   : > { %702 = vmatmul.bf16.gmra.mxu0 %v562_v55  ;;  %1026 = vmatmul.bf16.gmra.mxu1 %v921_v56  ;;  %v766_v62 = vunpack.c.l.bf16 %v729_v58 }
 0x164   : > { %1371 = vmatpush.bf16.msra.mxu2 %v2096_v50 }
 0x165   : > { %v799_v4 = vadd.f32 %v2327_v18, %v766_v62  ;;  %v1119_v62 = vpack.i.b16 %v2317_v3, %v2317_v3 }
 0x167   : > { %v895_v10 = vmax.f32 %v799_v4, 0.0 }
 0x168   : > { %v665_v63 = vpop.f32.mrf.mxu0 }
 0x169   : > { %v730_v1 = vpack.c.bf16 %v665_v63, %v665_v63 }
 0x16b   : > { %v767_v5 = vunpack.c.l.bf16 %v730_v1 }
 0x16d   : > { %v800_v7 = vadd.f32 %v2327_v18, %v767_v5 }
 0x16f   : > { %v896_v11 = vmax.f32 %v800_v7, 0.0  ;;  %v1121_v7 = vperm.slane %v1119_v62, 1 }
 0x170   : > { %v668_v12 = vpop.f32.mrf.mxu0 }
 0x171   : > { %v922_v14 = vpack.c.bf16 %v896_v11, %v895_v10  ;;  %v731_v17 = vpack.c.bf16 %v668_v12, %v668_v12  ;;  %v2399_v11 = vunpack.c.l.bf16 %v1121_v7 }
 0x173   : > { %707 = vmatmul.bf16.gmra.mxu0 %v563_v13  ;;  %1031 = vmatmul.bf16.gmra.mxu1 %v922_v14  ;;  %v768_v22 = vunpack.c.l.bf16 %v731_v17 }
 0x175   : > { %v801_v28 = vadd.f32 %v2327_v18, %v768_v22 }
 0x177   : > { %v897_v33 = vmax.f32 %v801_v28, 0.0 }
 0x178   : > { %v670_v23 = vpop.f32.mrf.mxu0 }
 0x179   : > { %v732_v26 = vpack.c.bf16 %v670_v23, %v670_v23 }
 0x17b   : > { %v769_v29 = vunpack.c.l.bf16 %v732_v26 }
 0x17d   : > { %v802_v31 = vadd.f32 %v2327_v18, %v769_v29 }
 0x17f   : > { %v898_v34 = vmax.f32 %v802_v31, 0.0 }
 0x180   : > { %v673_v44 = vpop.f32.mrf.mxu0 }
 0x181   : > { %v923_v36 = vpack.c.bf16 %v898_v34, %v897_v33  ;;  %v733_v38 = vpack.c.bf16 %v673_v44, %v673_v44 }
 0x183   : > { %712 = vmatmul.bf16.gmra.mxu0 %v564_v35  ;;  %1036 = vmatmul.bf16.gmra.mxu1 %v923_v36  ;;  %v770_v40 = vunpack.c.l.bf16 %v733_v38 }
 0x185   : > { %v803_v47 = vadd.f32 %v2327_v18, %v770_v40 }
 0x187   : > { %v899_v51 = vmax.f32 %v803_v47, 0.0 }
 0x188   : > { %v675_v41 = vpop.f32.mrf.mxu0 }
 0x189   : > { %v734_v45 = vpack.c.bf16 %v675_v41, %v675_v41 }
 0x18b   : > { %v771_v48 = vunpack.c.l.bf16 %v734_v45 }
 0x18d   : > { %v804_v49 = vadd.f32 %v2327_v18, %v771_v48 }
 0x18f   : > { %v900_v52 = vmax.f32 %v804_v49, 0.0 }
 0x190   : > { %v678_v53 = vpop.f32.mrf.mxu0 }
 0x191   : > { %v924_v54 = vpack.c.bf16 %v900_v52, %v899_v51  ;;  %v735_v55 = vpack.c.bf16 %v678_v53, %v678_v53 }
 0x193   : > { %1041 = vmatmul.bf16.gmra.mxu1 %v924_v54  ;;  %v772_v56 = vunpack.c.l.bf16 %v735_v55 }
 0x195   : > { %v805_v59 = vadd.f32 %v2327_v18, %v772_v56 }
 0x197   : > { %v901_v63 = vmax.f32 %v805_v59, 0.0 }
 0x198   : > { %v680_v57 = vpop.f32.mrf.mxu0 }
 0x199   : > { %v736_v58 = vpack.c.bf16 %v680_v57, %v680_v57 }
 0x19b   : > { %v773_v60 = vunpack.c.l.bf16 %v736_v58 }
 0x19d   : > { %v806_v61 = vadd.f32 %v2327_v18, %v773_v60 }
 0x19f   : > { %v902_v0 = vmax.f32 %v806_v61, 0.0 }
 0x1a0   : > { %v683_v1 = vpop.f32.mrf.mxu0  ;;  %v1007_v2 = vpop.f32.mrf.mxu1 }
 0x1a1   : > { %v925_v4 = vpack.c.bf16 %v902_v0, %v901_v63  ;;  %v737_v5 = vpack.c.bf16 %v683_v1, %v683_v1  ;;  %v1087_v6 = vpack.c.bf16 %v1007_v2, %v1007_v2 }
 0x1a3   : > { %1046 = vmatmul.bf16.gmra.mxu1 %v925_v4  ;;  %v774_v8 = vunpack.c.l.bf16 %v737_v5  ;;  %v1122_v10 = vunpack.c.l.bf16 %v1087_v6 }
 0x1a5   : > { %v807_v43 = vadd.f32 %v2327_v18, %v774_v8  ;;  %v1155_v3 = vadd.f32 %v2399_v11, %v1122_v10 }
 0x1a7   : > { %v903_v21 = vmax.f32 %v807_v43, 0.0  ;;  %v1251_v23 = vmax.f32 %v1155_v3, 0.0 }
 0x1a8   : > { %v685_v12 = vpop.f32.mrf.mxu0  ;;  %v1009_v13 = vpop.f32.mrf.mxu1 }
 0x1a9   : > { %v738_v14 = vpack.c.bf16 %v685_v12, %v685_v12  ;;  %v1088_v15 = vpack.c.bf16 %v1009_v13, %v1009_v13 }
 0x1ab   : > { %v775_v16 = vunpack.c.l.bf16 %v738_v14  ;;  %v1123_v17 = vunpack.c.l.bf16 %v1088_v15 }
 0x1ad   : > { %v808_v19 = vadd.f32 %v2327_v18, %v775_v16  ;;  %v1156_v20 = vadd.f32 %v2399_v11, %v1123_v17 }
 0x1af   : > { %v904_v22 = vmax.f32 %v808_v19, 0.0  ;;  %v1252_v24 = vmax.f32 %v1156_v20, 0.0 }
 0x1b0   : > { %v688_v25 = vpop.f32.mrf.mxu0  ;;  %v1012_v26 = vpop.f32.mrf.mxu1 }
 0x1b1   : > { %v926_v27 = vpack.c.bf16 %v904_v22, %v903_v21  ;;  %v1283_v28 = vpack.c.bf16 %v1252_v24, %v1251_v23  ;;  %v739_v29 = vpack.c.bf16 %v688_v25, %v688_v25  ;;  %v1089_v42 = vpack.c.bf16 %v1012_v26, %v1012_v26 }
 0x1b3   : > { %1051 = vmatmul.bf16.gmra.mxu1 %v926_v27  ;;  %1372 = vmatmul.bf16.vlgmr.msra.gmra.mxu2 %v1283_v28  ;;  %v776_v30 = vunpack.c.l.bf16 %v739_v29  ;;  %v1124_v31 = vunpack.c.l.bf16 %v1089_v42 }
 0x1b5   : > { %v809_v35 = vadd.f32 %v2327_v18, %v776_v30  ;;  %v1157_v36 = vadd.f32 %v2399_v11, %v1124_v31 }
 0x1b7   : > { %v905_v41 = vmax.f32 %v809_v35, 0.0  ;;  %v1253_v46 = vmax.f32 %v1157_v36, 0.0 }
 0x1b8   : > { %v690_v32 = vpop.f32.mrf.mxu0  ;;  %v1014_v33 = vpop.f32.mrf.mxu1 }
 0x1b9   : > { %v740_v34 = vpack.c.bf16 %v690_v32, %v690_v32  ;;  %v1090_v44 = vpack.c.bf16 %v1014_v33, %v1014_v33 }
 0x1bb   : > { %v777_v37 = vunpack.c.l.bf16 %v740_v34  ;;  %v1125_v38 = vunpack.c.l.bf16 %v1090_v44 }
 0x1bd   : > { %v810_v39 = vadd.f32 %v2327_v18, %v777_v37  ;;  %v1158_v40 = vadd.f32 %v2399_v11, %v1125_v38 }
 0x1bf   : > { %v906_v45 = vmax.f32 %v810_v39, 0.0  ;;  %v1254_v47 = vmax.f32 %v1158_v40, 0.0 }
 0x1c0   : > { %v693_v48 = vpop.f32.mrf.mxu0  ;;  %v1017_v49 = vpop.f32.mrf.mxu1 }
 0x1c1   : > { %v927_v50 = vpack.c.bf16 %v906_v45, %v905_v41  ;;  %v1284_v51 = vpack.c.bf16 %v1254_v47, %v1253_v46  ;;  %v741_v52 = vpack.c.bf16 %v693_v48, %v693_v48  ;;  %v1091_v53 = vpack.c.bf16 %v1017_v49, %v1017_v49 }
 0x1c3   : > { %1056 = vmatmul.bf16.gmra.mxu1 %v927_v50  ;;  %1377 = vmatmul.bf16.gmra.mxu2 %v1284_v51  ;;  %v778_v54 = vunpack.c.l.bf16 %v741_v52  ;;  %v1126_v55 = vunpack.c.l.bf16 %v1091_v53 }
 0x1c5   : > { %v811_v60 = vadd.f32 %v2327_v18, %v778_v54  ;;  %v1159_v61 = vadd.f32 %v2399_v11, %v1126_v55 }
 0x1c7   : > { %v907_v2 = vmax.f32 %v811_v60, 0.0  ;;  %v1255_v5 = vmax.f32 %v1159_v61, 0.0 }
 0x1c8   : > { %v695_v56 = vpop.f32.mrf.mxu0  ;;  %v1019_v57 = vpop.f32.mrf.mxu1 }
 0x1c9   : > { %v742_v58 = vpack.c.bf16 %v695_v56, %v695_v56  ;;  %v1092_v59 = vpack.c.bf16 %v1019_v57, %v1019_v57 }
 0x1cb   : > { %v779_v62 = vunpack.c.l.bf16 %v742_v58  ;;  %v1127_v63 = vunpack.c.l.bf16 %v1092_v59 }
 0x1cd   : > { %v812_v0 = vadd.f32 %v2327_v18, %v779_v62  ;;  %v1160_v1 = vadd.f32 %v2399_v11, %v1127_v63 }
 0x1cf   : > { %v908_v4 = vmax.f32 %v812_v0, 0.0  ;;  %v1256_v6 = vmax.f32 %v1160_v1, 0.0 }
 0x1d0   : > { %v698_v7 = vpop.f32.mrf.mxu0  ;;  %v1022_v8 = vpop.f32.mrf.mxu1 }
 0x1d1   : > { %v928_v10 = vpack.c.bf16 %v908_v4, %v907_v2  ;;  %v1285_v12 = vpack.c.bf16 %v1256_v6, %v1255_v5  ;;  %v743_v13 = vpack.c.bf16 %v698_v7, %v698_v7  ;;  %v1093_v14 = vpack.c.bf16 %v1022_v8, %v1022_v8 }
 0x1d3   : > { %1061 = vmatmul.bf16.gmra.mxu1 %v928_v10  ;;  %1382 = vmatmul.bf16.gmra.mxu2 %v1285_v12  ;;  %v780_v15 = vunpack.c.l.bf16 %v743_v13  ;;  %v1128_v43 = vunpack.c.l.bf16 %v1093_v14 }
 0x1d5   : > { %v813_v20 = vadd.f32 %v2327_v18, %v780_v15  ;;  %v1161_v21 = vadd.f32 %v2399_v11, %v1128_v43 }
 0x1d7   : > { %v909_v26 = vmax.f32 %v813_v20, 0.0  ;;  %v1257_v28 = vmax.f32 %v1161_v21, 0.0 }
 0x1d8   : > { %v700_v3 = vpop.f32.mrf.mxu0  ;;  %v1024_v16 = vpop.f32.mrf.mxu1 }
 0x1d9   : > { %v744_v17 = vpack.c.bf16 %v700_v3, %v700_v3  ;;  %v1094_v19 = vpack.c.bf16 %v1024_v16, %v1024_v16 }
 0x1db   : > { %v781_v22 = vunpack.c.l.bf16 %v744_v17  ;;  %v1129_v23 = vunpack.c.l.bf16 %v1094_v19 }
 0x1dd   : > { %v814_v24 = vadd.f32 %v2327_v18, %v781_v22  ;;  %v1162_v25 = vadd.f32 %v2399_v11, %v1129_v23  ;;  %v2111_v23 = vld [vmem:[%s2621_s4 + $0x38] sm:$0xff] }
 0x1de   : > { %1731 = vmatpush.bf16.msra.mxu3 %v2111_v23 }
 0x1df   : > { %v910_v27 = vmax.f32 %v814_v24, 0.0  ;;  %v1258_v29 = vmax.f32 %v1162_v25, 0.0 }
 0x1e0   : > { %v703_v42 = vpop.f32.mrf.mxu0  ;;  %v1027_v30 = vpop.f32.mrf.mxu1 }
 0x1e1   : > { %v929_v31 = vpack.c.bf16 %v910_v27, %v909_v26  ;;  %v1286_v32 = vpack.c.bf16 %v1258_v29, %v1257_v28  ;;  %v745_v33 = vpack.c.bf16 %v703_v42, %v703_v42  ;;  %v1095_v34 = vpack.c.bf16 %v1027_v30, %v1027_v30  ;;  %v2110_v42 = vld [vmem:[%s2621_s4 + $0x30] sm:$0xff] }
 0x1e2   : > { %1732 = vmatpush.bf16.msra.mxu3 %v2110_v42 }
 0x1e3   : > { %1066 = vmatmul.bf16.gmra.mxu1 %v929_v31  ;;  %1387 = vmatmul.bf16.gmra.mxu2 %v1286_v32  ;;  %v782_v44 = vunpack.c.l.bf16 %v745_v33  ;;  %v1130_v35 = vunpack.c.l.bf16 %v1095_v34 }
 0x1e5   : > { %v815_v40 = vadd.f32 %v2327_v18, %v782_v44  ;;  %v1163_v41 = vadd.f32 %v2399_v11, %v1130_v35 }
 0x1e7   : > { %v911_v49 = vmax.f32 %v815_v40, 0.0  ;;  %v1259_v51 = vmax.f32 %v1163_v41, 0.0 }
 0x1e8   : > { %v705_v36 = vpop.f32.mrf.mxu0  ;;  %v1029_v37 = vpop.f32.mrf.mxu1 }
 0x1e9   : > { %v746_v38 = vpack.c.bf16 %v705_v36, %v705_v36  ;;  %v1096_v39 = vpack.c.bf16 %v1029_v37, %v1029_v37  ;;  %v2109_v36 = vld [vmem:[%s2621_s4 + $0x28] sm:$0xff] }
 0x1ea   : > { %1733 = vmatpush.bf16.msra.mxu3 %v2109_v36 }
 0x1eb   : > { %v783_v45 = vunpack.c.l.bf16 %v746_v38  ;;  %v1131_v46 = vunpack.c.l.bf16 %v1096_v39 }
 0x1ed   : > { %v816_v47 = vadd.f32 %v2327_v18, %v783_v45  ;;  %v1164_v48 = vadd.f32 %v2399_v11, %v1131_v46  ;;  %v2107_v45 = vld [vmem:[%s2621_s4 + $0x18] sm:$0xff] }
 0x1ef   : > { %v912_v50 = vmax.f32 %v816_v47, 0.0  ;;  %v1260_v52 = vmax.f32 %v1164_v48, 0.0 }
 0x1f0   : > { %v708_v53 = vpop.f32.mrf.mxu0  ;;  %v1032_v54 = vpop.f32.mrf.mxu1 }
 0x1f1   : > { %v930_v55 = vpack.c.bf16 %v912_v50, %v911_v49  ;;  %v1287_v56 = vpack.c.bf16 %v1260_v52, %v1259_v51  ;;  %v747_v57 = vpack.c.bf16 %v708_v53, %v708_v53  ;;  %v1097_v58 = vpack.c.bf16 %v1032_v54, %v1032_v54  ;;  %v2106_v49 = vld [vmem:[%s2621_s4 + $0x10] sm:$0xff]  ;;  %v2105_v54 = vld [vmem:[%s2621_s4 + $0x8] sm:$0xff] }
 0x1f3   : > { %1071 = vmatmul.bf16.gmra.mxu1 %v930_v55  ;;  %1392 = vmatmul.bf16.gmra.mxu2 %v1287_v56  ;;  %v784_v59 = vunpack.c.l.bf16 %v747_v57  ;;  %v1132_v60 = vunpack.c.l.bf16 %v1097_v58  ;;  %v2104_v57 = vld [vmem:[%s2621_s4] sm:$0xff] }
 0x1f5   : > { %v817_v1 = vadd.f32 %v2327_v18, %v784_v59  ;;  %v1165_v2 = vadd.f32 %v2399_v11, %v1132_v60 }
 0x1f7   : > { %v913_v8 = vmax.f32 %v817_v1, 0.0  ;;  %v1261_v12 = vmax.f32 %v1165_v2, 0.0 }
 0x1f8   : > { %v710_v61 = vpop.f32.mrf.mxu0  ;;  %v1034_v62 = vpop.f32.mrf.mxu1 }
 0x1f9   : > { %v748_v63 = vpack.c.bf16 %v710_v61, %v710_v61  ;;  %v1098_v0 = vpack.c.bf16 %v1034_v62, %v1034_v62 }
 0x1fb   : > { %v785_v4 = vunpack.c.l.bf16 %v748_v63  ;;  %v1133_v5 = vunpack.c.l.bf16 %v1098_v0 }
 0x1fd   : > { %v818_v6 = vadd.f32 %v2327_v18, %v785_v4  ;;  %v1166_v7 = vadd.f32 %v2399_v11, %v1133_v5 }
 0x1ff   : > { %v914_v10 = vmax.f32 %v818_v6, 0.0  ;;  %v1262_v13 = vmax.f32 %v1166_v7, 0.0 }
 0x200   : > { %v713_v14 = vpop.f32.mrf.mxu0  ;;  %v1037_v15 = vpop.f32.mrf.mxu1 }
 0x201   : > { %v931_v43 = vpack.c.bf16 %v914_v10, %v913_v8  ;;  %v1288_v3 = vpack.c.bf16 %v1262_v13, %v1261_v12  ;;  %v749_v16 = vpack.c.bf16 %v713_v14, %v713_v14  ;;  %v1099_v17 = vpack.c.bf16 %v1037_v15, %v1037_v15 }
 0x202   : > { %v1485_v12 = vperm.slane %v2322_v9, 1 }
 0x203   : > { %1076 = vmatmul.bf16.gmra.mxu1 %v931_v43  ;;  %1397 = vmatmul.bf16.gmra.mxu2 %v1288_v3  ;;  %v786_v19 = vunpack.c.l.bf16 %v749_v16  ;;  %v1134_v20 = vunpack.c.l.bf16 %v1099_v17 }
 0x204   : > { %v2459_v3 = vunpack.c.l.bf16 %v1485_v12 }
 0x205   : > { %v819_v26 = vadd.f32 %v2327_v18, %v786_v19  ;;  %v1167_v27 = vadd.f32 %v2399_v11, %v1134_v20 }
 0x207   : > { %v915_v32 = vmax.f32 %v819_v26, 0.0  ;;  %v1263_v34 = vmax.f32 %v1167_v27, 0.0 }
 0x208   : > { %v715_v21 = vpop.f32.mrf.mxu0  ;;  %v1039_v22 = vpop.f32.mrf.mxu1 }
 0x209   : > { %v750_v24 = vpack.c.bf16 %v715_v21, %v715_v21  ;;  %v1100_v25 = vpack.c.bf16 %v1039_v22, %v1039_v22 }
 0x20b   : > { %v787_v28 = vunpack.c.l.bf16 %v750_v24  ;;  %v1135_v29 = vunpack.c.l.bf16 %v1100_v25 }
 0x20d   : > { %v820_v30 = vadd.f32 %v2327_v18, %v787_v28  ;;  %v1168_v31 = vadd.f32 %v2399_v11, %v1135_v29  ;;  %v2108_v18 = vld [vmem:[%s2621_s4 + $0x20] sm:$0xff] }
 0x20e   : > { %1734 = vmatpush.bf16.msra.mxu3 %v2108_v18 }
 0x20f   : > { %v916_v33 = vmax.f32 %v820_v30, 0.0  ;;  %v1264_v44 = vmax.f32 %v1168_v31, 0.0 }
 0x210   : > { %v1042_v35 = vpop.f32.mrf.mxu1 }
 0x211   : > { %v932_v37 = vpack.c.bf16 %v916_v33, %v915_v32  ;;  %v1289_v38 = vpack.c.bf16 %v1264_v44, %v1263_v34  ;;  %v1101_v39 = vpack.c.bf16 %v1042_v35, %v1042_v35 }
 0x212   : > { %1735 = vmatpush.bf16.msra.mxu3 %v2107_v45 }
 0x213   : > { %1081 = vmatmul.bf16.gmra.mxu1 %v932_v37  ;;  %1402 = vmatmul.bf16.gmra.mxu2 %v1289_v38  ;;  %v1136_v40 = vunpack.c.l.bf16 %v1101_v39 }
 0x215   : > { %v1169_v47 = vadd.f32 %v2399_v11, %v1136_v40 }
 0x216   : > { %1736 = vmatpush.bf16.msra.mxu3 %v2106_v49 }
 0x217   : > { %v1265_v51 = vmax.f32 %v1169_v47, 0.0 }
 0x218   : > { %v1044_v41 = vpop.f32.mrf.mxu1 }
 0x219   : > { %v1102_v46 = vpack.c.bf16 %v1044_v41, %v1044_v41 }
 0x21a   : > { %1737 = vmatpush.bf16.msra.mxu3 %v2105_v54 }
 0x21b   : > { %v1137_v48 = vunpack.c.l.bf16 %v1102_v46 }
 0x21d   : > { %v1170_v50 = vadd.f32 %v2399_v11, %v1137_v48 }
 0x21e   : > { %1738 = vmatpush.bf16.msra.mxu3 %v2104_v57 }
 0x21f   : > { %v1266_v52 = vmax.f32 %v1170_v50, 0.0 }
 0x220   : > { %v1047_v53 = vpop.f32.mrf.mxu1 }
 0x221   : > { %v1290_v55 = vpack.c.bf16 %v1266_v52, %v1265_v51  ;;  %v1103_v56 = vpack.c.bf16 %v1047_v53, %v1047_v53 }
 0x223   : > { %1407 = vmatmul.bf16.gmra.mxu2 %v1290_v55  ;;  %v1138_v58 = vunpack.c.l.bf16 %v1103_v56 }
 0x225   : > { %v1171_v61 = vadd.f32 %v2399_v11, %v1138_v58 }
 0x227   : > { %v1267_v0 = vmax.f32 %v1171_v61, 0.0 }
 0x228   : > { %v1049_v59 = vpop.f32.mrf.mxu1 }
 0x229   : > { %v1104_v60 = vpack.c.bf16 %v1049_v59, %v1049_v59 }
 0x22b   : > { %v1139_v62 = vunpack.c.l.bf16 %v1104_v60 }
 0x22d   : > { %v1172_v63 = vadd.f32 %v2399_v11, %v1139_v62 }
 0x22f   : > { %v1268_v1 = vmax.f32 %v1172_v63, 0.0 }
 0x230   : > { %v1052_v2 = vpop.f32.mrf.mxu1 }
 0x231   : > { %v1291_v4 = vpack.c.bf16 %v1268_v1, %v1267_v0  ;;  %v1105_v5 = vpack.c.bf16 %v1052_v2, %v1052_v2 }
 0x233   : > { %1412 = vmatmul.bf16.gmra.mxu2 %v1291_v4  ;;  %v1140_v7 = vunpack.c.l.bf16 %v1105_v5 }
 0x235   : > { %v1173_v14 = vadd.f32 %v2399_v11, %v1140_v7 }
 0x236   : > { %v1373_v6 = vpop.f32.mrf.mxu2 }
 0x237   : > { %v1453_v10 = vpack.c.bf16 %v1373_v6, %v1373_v6  ;;  %v1269_v20 = vmax.f32 %v1173_v14, 0.0 }
 0x238   : > { %v1054_v8 = vpop.f32.mrf.mxu1 }
 0x239   : > { %v1106_v13 = vpack.c.bf16 %v1054_v8, %v1054_v8  ;;  %v1486_v43 = vunpack.c.l.bf16 %v1453_v10 }
 0x23b   : > { %v1141_v15 = vunpack.c.l.bf16 %v1106_v13  ;;  %v1519_v23 = vadd.f32 %v2459_v3, %v1486_v43 }
 0x23d   : > { %v1174_v16 = vadd.f32 %v2399_v11, %v1141_v15  ;;  %v1615_v27 = vmax.f32 %v1519_v23, 0.0 }
 0x23e   : > { %v1375_v17 = vpop.f32.mrf.mxu2 }
 0x23f   : > { %v1454_v19 = vpack.c.bf16 %v1375_v17, %v1375_v17  ;;  %v1270_v21 = vmax.f32 %v1174_v16, 0.0 }
 0x240   : > { %v1057_v22 = vpop.f32.mrf.mxu1 }
 0x241   : > { %v1487_v24 = vunpack.c.l.bf16 %v1454_v19  ;;  %v1292_v25 = vpack.c.bf16 %v1270_v21, %v1269_v20  ;;  %v1107_v26 = vpack.c.bf16 %v1057_v22, %v1057_v22 }
 0x243   : > { %1417 = vmatmul.bf16.gmra.mxu2 %v1292_v25  ;;  %v1520_v9 = vadd.f32 %v2459_v3, %v1487_v24  ;;  %v1142_v42 = vunpack.c.l.bf16 %v1107_v26 }
 0x245   : > { %v1616_v28 = vmax.f32 %v1520_v9, 0.0  ;;  %v1175_v34 = vadd.f32 %v2399_v11, %v1142_v42 }
 0x246   : > { %v1378_v29 = vpop.f32.mrf.mxu2 }
 0x247   : > { %v1647_v30 = vpack.c.bf16 %v1616_v28, %v1615_v27  ;;  %v1455_v32 = vpack.c.bf16 %v1378_v29, %v1378_v29  ;;  %v1271_v39 = vmax.f32 %v1175_v34, 0.0 }
 0x248   : > { %v1059_v31 = vpop.f32.mrf.mxu1 }
 0x249   : > { %v1108_v33 = vpack.c.bf16 %v1059_v31, %v1059_v31  ;;  %1739 = vmatmul.bf16.vlgmr.msra.gmra.mxu3 %v1647_v30  ;;  %v1488_v35 = vunpack.c.l.bf16 %v1455_v32 }
 0x24b   : > { %v1143_v44 = vunpack.c.l.bf16 %v1108_v33  ;;  %v1521_v41 = vadd.f32 %v2459_v3, %v1488_v35 }
 0x24d   : > { %v1176_v36 = vadd.f32 %v2399_v11, %v1143_v44  ;;  %v1617_v49 = vmax.f32 %v1521_v41, 0.0 }
 0x24e   : > { %v1380_v37 = vpop.f32.mrf.mxu2 }
 0x24f   : > { %v1456_v38 = vpack.c.bf16 %v1380_v37, %v1380_v37  ;;  %v1272_v18 = vmax.f32 %v1176_v36, 0.0 }
 0x250   : > { %v1062_v40 = vpop.f32.mrf.mxu1 }
 0x251   : > { %v1489_v45 = vunpack.c.l.bf16 %v1456_v38  ;;  %v1293_v46 = vpack.c.bf16 %v1272_v18, %v1271_v39  ;;  %v1109_v47 = vpack.c.bf16 %v1062_v40, %v1062_v40 }
 0x253   : > { %1422 = vmatmul.bf16.gmra.mxu2 %v1293_v46  ;;  %v1522_v48 = vadd.f32 %v2459_v3, %v1489_v45  ;;  %v1144_v52 = vunpack.c.l.bf16 %v1109_v47 }
 0x255   : > { %v1618_v50 = vmax.f32 %v1522_v48, 0.0  ;;  %v1177_v57 = vadd.f32 %v2399_v11, %v1144_v52 }
 0x256   : > { %v1383_v51 = vpop.f32.mrf.mxu2 }
 0x257   : > { %v1648_v53 = vpack.c.bf16 %v1618_v50, %v1617_v49  ;;  %v1457_v55 = vpack.c.bf16 %v1383_v51, %v1383_v51  ;;  %v1273_v63 = vmax.f32 %v1177_v57, 0.0 }
 0x258   : > { %v1064_v54 = vpop.f32.mrf.mxu1 }
 0x259   : > { %v1110_v56 = vpack.c.bf16 %v1064_v54, %v1064_v54  ;;  %1744 = vmatmul.bf16.gmra.mxu3 %v1648_v53  ;;  %v1490_v59 = vunpack.c.l.bf16 %v1457_v55 }
 0x25b   : > { %v1145_v58 = vunpack.c.l.bf16 %v1110_v56  ;;  %v1523_v2 = vadd.f32 %v2459_v3, %v1490_v59 }
 0x25d   : > { %v1178_v60 = vadd.f32 %v2399_v11, %v1145_v58  ;;  %v1619_v8 = vmax.f32 %v1523_v2, 0.0 }
 0x25e   : > { %v1385_v61 = vpop.f32.mrf.mxu2 }
 0x25f   : > { %v1458_v62 = vpack.c.bf16 %v1385_v61, %v1385_v61  ;;  %v1274_v0 = vmax.f32 %v1178_v60, 0.0 }
 0x260   : > { %v1067_v1 = vpop.f32.mrf.mxu1 }
 0x261   : > { %v1491_v4 = vunpack.c.l.bf16 %v1458_v62  ;;  %v1294_v5 = vpack.c.bf16 %v1274_v0, %v1273_v63  ;;  %v1111_v6 = vpack.c.bf16 %v1067_v1, %v1067_v1 }
 0x263   : > { %1427 = vmatmul.bf16.gmra.mxu2 %v1294_v5  ;;  %v1524_v7 = vadd.f32 %v2459_v3, %v1491_v4  ;;  %v1146_v13 = vunpack.c.l.bf16 %v1111_v6 }
 0x265   : > { %v1620_v10 = vmax.f32 %v1524_v7, 0.0  ;;  %v1179_v17 = vadd.f32 %v2399_v11, %v1146_v13 }
 0x266   : > { %v1388_v12 = vpop.f32.mrf.mxu2 }
 0x267   : > { %v1649_v14 = vpack.c.bf16 %v1620_v10, %v1619_v8  ;;  %v1459_v43 = vpack.c.bf16 %v1388_v12, %v1388_v12  ;;  %v1275_v23 = vmax.f32 %v1179_v17, 0.0 }
 0x268   : > { %v1069_v15 = vpop.f32.mrf.mxu1 }
 0x269   : > { %v1112_v16 = vpack.c.bf16 %v1069_v15, %v1069_v15  ;;  %1749 = vmatmul.bf16.gmra.mxu3 %v1649_v14  ;;  %v1492_v20 = vunpack.c.l.bf16 %v1459_v43 }
 0x26b   : > { %v1147_v19 = vunpack.c.l.bf16 %v1112_v16  ;;  %v1525_v9 = vadd.f32 %v2459_v3, %v1492_v20 }
 0x26d   : > { %v1180_v21 = vadd.f32 %v2399_v11, %v1147_v19  ;;  %v1621_v30 = vmax.f32 %v1525_v9, 0.0 }
 0x26e   : > { %v1390_v22 = vpop.f32.mrf.mxu2 }
 0x26f   : > { %v1276_v24 = vmax.f32 %v1180_v21, 0.0  ;;  %v1460_v25 = vpack.c.bf16 %v1390_v22, %v1390_v22 }
 0x270   : > { %v1072_v26 = vpop.f32.mrf.mxu1 }
 0x271   : > { %v1493_v27 = vunpack.c.l.bf16 %v1460_v25  ;;  %v1295_v28 = vpack.c.bf16 %v1276_v24, %v1275_v23  ;;  %v1113_v29 = vpack.c.bf16 %v1072_v26, %v1072_v26 }
 0x273   : > { %1432 = vmatmul.bf16.gmra.mxu2 %v1295_v28  ;;  %v1526_v42 = vadd.f32 %v2459_v3, %v1493_v27  ;;  %v1148_v33 = vunpack.c.l.bf16 %v1113_v29 }
 0x275   : > { %v1622_v31 = vmax.f32 %v1526_v42, 0.0  ;;  %v1181_v37 = vadd.f32 %v2399_v11, %v1148_v33 }
 0x276   : > { %v1393_v32 = vpop.f32.mrf.mxu2 }
 0x277   : > { %v1650_v34 = vpack.c.bf16 %v1622_v31, %v1621_v30  ;;  %v1461_v35 = vpack.c.bf16 %v1393_v32, %v1393_v32  ;;  %v1277_v41 = vmax.f32 %v1181_v37, 0.0 }
 0x278   : > { %v1074_v44 = vpop.f32.mrf.mxu1 }
 0x279   : > { %v1114_v36 = vpack.c.bf16 %v1074_v44, %v1074_v44  ;;  %1754 = vmatmul.bf16.gmra.mxu3 %v1650_v34  ;;  %v1494_v39 = vunpack.c.l.bf16 %v1461_v35 }
 0x27b   : > { %v1149_v38 = vunpack.c.l.bf16 %v1114_v36  ;;  %v1527_v48 = vadd.f32 %v2459_v3, %v1494_v39 }
 0x27d   : > { %v1182_v18 = vadd.f32 %v2399_v11, %v1149_v38  ;;  %v1623_v53 = vmax.f32 %v1527_v48, 0.0 }
 0x27e   : > { %v1395_v40 = vpop.f32.mrf.mxu2 }
 0x27f   : > { %v1278_v45 = vmax.f32 %v1182_v18, 0.0  ;;  %v1462_v46 = vpack.c.bf16 %v1395_v40, %v1395_v40 }
 0x280   : > { %v1077_v47 = vpop.f32.mrf.mxu1 }
 0x281   : > { %v1495_v49 = vunpack.c.l.bf16 %v1462_v46  ;;  %v1296_v50 = vpack.c.bf16 %v1278_v45, %v1277_v41  ;;  %v1115_v52 = vpack.c.bf16 %v1077_v47, %v1077_v47 }
 0x283   : > { %v1528_v51 = vadd.f32 %v2459_v3, %v1495_v49  ;;  %1437 = vmatmul.bf16.gmra.mxu2 %v1296_v50  ;;  %v1150_v56 = vunpack.c.l.bf16 %v1115_v52 }
 0x285   : > { %v1624_v54 = vmax.f32 %v1528_v51, 0.0  ;;  %v1183_v61 = vadd.f32 %v2399_v11, %v1150_v56 }
 0x286   : > { %v1398_v55 = vpop.f32.mrf.mxu2 }
 0x287   : > { %v1651_v57 = vpack.c.bf16 %v1624_v54, %v1623_v53  ;;  %v1463_v59 = vpack.c.bf16 %v1398_v55, %v1398_v55  ;;  %v1279_v2 = vmax.f32 %v1183_v61, 0.0 }
 0x288   : > { %v1079_v58 = vpop.f32.mrf.mxu1 }
 0x289   : > { %v1116_v60 = vpack.c.bf16 %v1079_v58, %v1079_v58  ;;  %1759 = vmatmul.bf16.gmra.mxu3 %v1651_v57  ;;  %v1496_v63 = vunpack.c.l.bf16 %v1463_v59  ;;  %v2495_v59 = vld [vmem:[%s2622_s5] ss:$0 sm:$0xff] }
 0x28b   : > { %v1151_v62 = vunpack.c.l.bf16 %v1116_v60  ;;  %v1529_v7 = vadd.f32 %v2459_v3, %v1496_v63 }
 0x28d   : > { %v1184_v0 = vadd.f32 %v2399_v11, %v1151_v62  ;;  %v1625_v14 = vmax.f32 %v1529_v7, 0.0 }
 0x28e   : > { %v1400_v1 = vpop.f32.mrf.mxu2 }
 0x28f   : > { %v1280_v4 = vmax.f32 %v1184_v0, 0.0  ;;  %v1464_v5 = vpack.c.bf16 %v1400_v1, %v1400_v1 }
 0x290   : > { %v1082_v6 = vpop.f32.mrf.mxu1 }
 0x291   : > { %v1497_v8 = vunpack.c.l.bf16 %v1464_v5  ;;  %v1297_v10 = vpack.c.bf16 %v1280_v4, %v1279_v2  ;;  %v1117_v13 = vpack.c.bf16 %v1082_v6, %v1082_v6 }
 0x293   : > { %v1530_v12 = vadd.f32 %v2459_v3, %v1497_v8  ;;  %1442 = vmatmul.bf16.gmra.mxu2 %v1297_v10  ;;  %v1152_v16 = vunpack.c.l.bf16 %v1117_v13 }
 0x295   : > { %v1626_v15 = vmax.f32 %v1530_v12, 0.0  ;;  %v1185_v22 = vadd.f32 %v2399_v11, %v1152_v16 }
 0x296   : > { %v1403_v43 = vpop.f32.mrf.mxu2 }
 0x297   : > { %v1652_v17 = vpack.c.bf16 %v1626_v15, %v1625_v14  ;;  %v1465_v20 = vpack.c.bf16 %v1403_v43, %v1403_v43  ;;  %v1281_v9 = vmax.f32 %v1185_v22, 0.0 }
 0x298   : > { %v1084_v19 = vpop.f32.mrf.mxu1 }
 0x299   : > { %v1118_v21 = vpack.c.bf16 %v1084_v19, %v1084_v19  ;;  %1764 = vmatmul.bf16.gmra.mxu3 %v1652_v17  ;;  %v1498_v24 = vunpack.c.l.bf16 %v1465_v20 }
 0x29b   : > { %v1153_v23 = vunpack.c.l.bf16 %v1118_v21  ;;  %v1531_v29 = vadd.f32 %v2459_v3, %v1498_v24 }
 0x29d   : > { %v1186_v25 = vadd.f32 %v2399_v11, %v1153_v23  ;;  %v1627_v32 = vmax.f32 %v1531_v29, 0.0 }
 0x29e   : > { %v1405_v26 = vpop.f32.mrf.mxu2 }
 0x29f   : > { %v1282_v27 = vmax.f32 %v1186_v25, 0.0  ;;  %v1466_v28 = vpack.c.bf16 %v1405_v26, %v1405_v26 }
 0x2a1   : > { %v1499_v42 = vunpack.c.l.bf16 %v1466_v28  ;;  %v1298_v30 = vpack.c.bf16 %v1282_v27, %v1281_v9 }
 0x2a3   : > { %v1532_v31 = vadd.f32 %v2459_v3, %v1499_v42  ;;  %1447 = vmatmul.bf16.gmra.mxu2 %v1298_v30 }
 0x2a5   : > { %v1628_v33 = vmax.f32 %v1532_v31, 0.0 }
 0x2a6   : > { %v1408_v34 = vpop.f32.mrf.mxu2 }
 0x2a7   : > { %v1653_v44 = vpack.c.bf16 %v1628_v33, %v1627_v32  ;;  %v1467_v35 = vpack.c.bf16 %v1408_v34, %v1408_v34 }
 0x2a9   : > { %1769 = vmatmul.bf16.gmra.mxu3 %v1653_v44  ;;  %v1500_v36 = vunpack.c.l.bf16 %v1467_v35 }
 0x2ab   : > { %v1533_v38 = vadd.f32 %v2459_v3, %v1500_v36 }
 0x2ad   : > { %v1629_v40 = vmax.f32 %v1533_v38, 0.0 }
 0x2ae   : > { %v1410_v37 = vpop.f32.mrf.mxu2 }
 0x2af   : > { %v1468_v11 = vpack.c.bf16 %v1410_v37, %v1410_v37 }
 0x2b1   : > { %v1501_v39 = vunpack.c.l.bf16 %v1468_v11 }
 0x2b3   : > { %v1534_v18 = vadd.f32 %v2459_v3, %v1501_v39 }
 0x2b5   : > { %v1630_v41 = vmax.f32 %v1534_v18, 0.0 }
 0x2b6   : > { %v1413_v45 = vpop.f32.mrf.mxu2 }
 0x2b7   : > { %v1654_v46 = vpack.c.bf16 %v1630_v41, %v1629_v40  ;;  %v1469_v47 = vpack.c.bf16 %v1413_v45, %v1413_v45 }
 0x2b9   : > { %1774 = vmatmul.bf16.gmra.mxu3 %v1654_v46  ;;  %v1502_v48 = vunpack.c.l.bf16 %v1469_v47 }
 0x2bb   : > { %v1535_v51 = vadd.f32 %v2459_v3, %v1502_v48 }
 0x2bd   : > { %v1631_v54 = vmax.f32 %v1535_v51, 0.0 }
 0x2be   : > { %v1415_v49 = vpop.f32.mrf.mxu2 }
 0x2bf   : > { %v1470_v50 = vpack.c.bf16 %v1415_v49, %v1415_v49 }
 0x2c1   : > { %v1503_v52 = vunpack.c.l.bf16 %v1470_v50 }
 0x2c3   : > { %v1536_v53 = vadd.f32 %v2459_v3, %v1503_v52 }
 0x2c5   : > { %v1632_v55 = vmax.f32 %v1536_v53, 0.0 }
 0x2c6   : > { %v1418_v56 = vpop.f32.mrf.mxu2 }
 0x2c7   : > { %v1655_v57 = vpack.c.bf16 %v1632_v55, %v1631_v54  ;;  %v1471_v58 = vpack.c.bf16 %v1418_v56, %v1418_v56 }
 0x2c9   : > { %1779 = vmatmul.bf16.gmra.mxu3 %v1655_v57  ;;  %v1504_v61 = vunpack.c.l.bf16 %v1471_v58 }
 0x2cb   : > { %v1537_v1 = vadd.f32 %v2459_v3, %v1504_v61 }
 0x2cc   : > { %v1740_v60 = vpop.f32.mrf.mxu3 }
 0x2cd   : > { %v1741_v62 = vadd.f32 %v2495_v59, %v1740_v60  ;;  %v1633_v7 = vmax.f32 %v1537_v1, 0.0 }
 0x2ce   : > { %v1420_v63 = vpop.f32.mrf.mxu2 }
 0x2cf   : > { %1821 = vst.msk [vmem:[%s2502_s13] sm:$0xff] %vm1820_vm0, %v1741_v62  ;;  %v1472_v0 = vpack.c.bf16 %v1420_v63, %v1420_v63 }
 0x2d1   : > { %v1505_v2 = vunpack.c.l.bf16 %v1472_v0 }
 0x2d3   : > { %v1538_v4 = vadd.f32 %v2459_v3, %v1505_v2 }
 0x2d4   : > { %v1742_v5 = vpop.f32.mrf.mxu3 }
 0x2d5   : > { %v1743_v6 = vadd.f32 %v2495_v59, %v1742_v5  ;;  %v1634_v8 = vmax.f32 %v1538_v4, 0.0 }
 0x2d6   : > { %v1423_v10 = vpop.f32.mrf.mxu2 }
 0x2d7   : > { %1822 = vst.msk [vmem:[%s2502_s13 + $0x8] sm:$0xff] %vm1820_vm0, %v1743_v6  ;;  %v1656_v12 = vpack.c.bf16 %v1634_v8, %v1633_v7  ;;  %v1473_v13 = vpack.c.bf16 %v1423_v10, %v1423_v10 }
 0x2d9   : > { %1784 = vmatmul.bf16.gmra.mxu3 %v1656_v12  ;;  %v1506_v15 = vunpack.c.l.bf16 %v1473_v13 }
 0x2db   : > { %v1539_v19 = vadd.f32 %v2459_v3, %v1506_v15 }
 0x2dc   : > { %v1745_v14 = vpop.f32.mrf.mxu3 }
 0x2dd   : > { %v1746_v43 = vadd.f32 %v2495_v59, %v1745_v14  ;;  %v1635_v24 = vmax.f32 %v1539_v19, 0.0 }
 0x2de   : > { %v1425_v16 = vpop.f32.mrf.mxu2 }
 0x2df   : > { %1823 = vst.msk [vmem:[%s2502_s13 + $0x10] sm:$0xff] %vm1820_vm0, %v1746_v43  ;;  %v1474_v17 = vpack.c.bf16 %v1425_v16, %v1425_v16 }
 0x2e1   : > { %v1507_v20 = vunpack.c.l.bf16 %v1474_v17 }
 0x2e3   : > { %v1540_v21 = vadd.f32 %v2459_v3, %v1507_v20 }
 0x2e4   : > { %v1747_v22 = vpop.f32.mrf.mxu3 }
 0x2e5   : > { %v1748_v23 = vadd.f32 %v2495_v59, %v1747_v22  ;;  %v1636_v25 = vmax.f32 %v1540_v21, 0.0 }
 0x2e6   : > { %v1428_v26 = vpop.f32.mrf.mxu2 }
 0x2e7   : > { %1824 = vst.msk [vmem:[%s2502_s13 + $0x18] sm:$0xff] %vm1820_vm0, %v1748_v23  ;;  %v1657_v9 = vpack.c.bf16 %v1636_v25, %v1635_v24  ;;  %v1475_v27 = vpack.c.bf16 %v1428_v26, %v1428_v26 }
 0x2e9   : > { %1789 = vmatmul.bf16.gmra.mxu3 %v1657_v9  ;;  %v1508_v29 = vunpack.c.l.bf16 %v1475_v27 }
 0x2eb   : > { %v1541_v32 = vadd.f32 %v2459_v3, %v1508_v29 }
 0x2ec   : > { %v1750_v28 = vpop.f32.mrf.mxu3 }
 0x2ed   : > { %v1751_v42 = vadd.f32 %v2495_v59, %v1750_v28  ;;  %v1637_v36 = vmax.f32 %v1541_v32, 0.0 }
 0x2ee   : > { %v1430_v30 = vpop.f32.mrf.mxu2 }
 0x2ef   : > { %1825 = vst.msk [vmem:[%s2502_s13 + $0x20] sm:$0xff] %vm1820_vm0, %v1751_v42  ;;  %v1476_v31 = vpack.c.bf16 %v1430_v30, %v1430_v30 }
 0x2f1   : > { %v1509_v33 = vunpack.c.l.bf16 %v1476_v31 }
 0x2f3   : > { %v1542_v34 = vadd.f32 %v2459_v3, %v1509_v33 }
 0x2f4   : > { %v1752_v44 = vpop.f32.mrf.mxu3 }
 0x2f5   : > { %v1753_v35 = vadd.f32 %v2495_v59, %v1752_v44  ;;  %v1638_v37 = vmax.f32 %v1542_v34, 0.0 }
 0x2f6   : > { %v1433_v11 = vpop.f32.mrf.mxu2 }
 0x2f7   : > { %1826 = vst.msk [vmem:[%s2502_s13 + $0x28] sm:$0xff] %vm1820_vm0, %v1753_v35  ;;  %v1658_v38 = vpack.c.bf16 %v1638_v37, %v1637_v36  ;;  %v1477_v39 = vpack.c.bf16 %v1433_v11, %v1433_v11 }
 0x2f9   : > { %1794 = vmatmul.bf16.gmra.mxu3 %v1658_v38  ;;  %v1510_v40 = vunpack.c.l.bf16 %v1477_v39 }
 0x2fb   : > { %v1543_v47 = vadd.f32 %v2459_v3, %v1510_v40 }
 0x2fc   : > { %v1755_v18 = vpop.f32.mrf.mxu3 }
 0x2fd   : > { %v1756_v41 = vadd.f32 %v2495_v59, %v1755_v18  ;;  %v1639_v51 = vmax.f32 %v1543_v47, 0.0 }
 0x2fe   : > { %v1435_v45 = vpop.f32.mrf.mxu2 }
 0x2ff   : > { %1827 = vst.msk [vmem:[%s2502_s13 + $0x30] sm:$0xff] %vm1820_vm0, %v1756_v41  ;;  %v1478_v46 = vpack.c.bf16 %v1435_v45, %v1435_v45 }
 0x301   : > { %v1511_v48 = vunpack.c.l.bf16 %v1478_v46 }
 0x303   : > { %v1544_v49 = vadd.f32 %v2459_v3, %v1511_v48 }
 0x304   : > { %v1757_v50 = vpop.f32.mrf.mxu3 }
 0x305   : > { %v1640_v52 = vmax.f32 %v1544_v49, 0.0  ;;  %v1758_v53 = vadd.f32 %v2495_v59, %v1757_v50 }
 0x306   : > { %v1438_v54 = vpop.f32.mrf.mxu2 }
 0x307   : > { %1828 = vst.msk [vmem:[%s2502_s13 + $0x38] sm:$0xff] %vm1820_vm0, %v1758_v53  ;;  %v1659_v55 = vpack.c.bf16 %v1640_v52, %v1639_v51  ;;  %v1479_v56 = vpack.c.bf16 %v1438_v54, %v1438_v54 }
 0x309   : > { %1799 = vmatmul.bf16.gmra.mxu3 %v1659_v55  ;;  %v1512_v58 = vunpack.c.l.bf16 %v1479_v56 }
 0x30b   : > { %v1545_v63 = vadd.f32 %v2459_v3, %v1512_v58 }
 0x30c   : > { %v1760_v57 = vpop.f32.mrf.mxu3 }
 0x30d   : > { %v1761_v60 = vadd.f32 %v2495_v59, %v1760_v57  ;;  %v1641_v4 = vmax.f32 %v1545_v63, 0.0 }
 0x30e   : > { %v1440_v61 = vpop.f32.mrf.mxu2 }
 0x30f   : > { %1829 = vst.msk [vmem:[%s2502_s13 + $0x40] sm:$0xff] %vm1820_vm0, %v1761_v60  ;;  %v1480_v62 = vpack.c.bf16 %v1440_v61, %v1440_v61 }
 0x311   : > { %v1513_v0 = vunpack.c.l.bf16 %v1480_v62 }
 0x313   : > { %v1546_v1 = vadd.f32 %v2459_v3, %v1513_v0 }
 0x314   : > { %v1762_v2 = vpop.f32.mrf.mxu3 }
 0x315   : > { %v1642_v5 = vmax.f32 %v1546_v1, 0.0  ;;  %v1763_v6 = vadd.f32 %v2495_v59, %v1762_v2 }
 0x316   : > { %v1443_v7 = vpop.f32.mrf.mxu2 }
 0x317   : > { %1830 = vst.msk [vmem:[%s2502_s13 + $0x48] sm:$0xff] %vm1820_vm0, %v1763_v6  ;;  %v1660_v8 = vpack.c.bf16 %v1642_v5, %v1641_v4  ;;  %v1481_v10 = vpack.c.bf16 %v1443_v7, %v1443_v7 }
 0x319   : > { %1804 = vmatmul.bf16.gmra.mxu3 %v1660_v8  ;;  %v1514_v13 = vunpack.c.l.bf16 %v1481_v10 }
 0x31b   : > { %v1547_v16 = vadd.f32 %v2459_v3, %v1514_v13 }
 0x31c   : > { %v1765_v12 = vpop.f32.mrf.mxu3 }
 0x31d   : > { %v1766_v14 = vadd.f32 %v2495_v59, %v1765_v12  ;;  %v1643_v21 = vmax.f32 %v1547_v16, 0.0 }
 0x31e   : > { %v1445_v15 = vpop.f32.mrf.mxu2 }
 0x31f   : > { %1831 = vst.msk [vmem:[%s2502_s13 + $0x50] sm:$0xff] %vm1820_vm0, %v1766_v14  ;;  %v1482_v43 = vpack.c.bf16 %v1445_v15, %v1445_v15 }
 0x321   : > { %v1515_v17 = vunpack.c.l.bf16 %v1482_v43 }
 0x323   : > { %v1548_v19 = vadd.f32 %v2459_v3, %v1515_v17 }
 0x324   : > { %v1767_v20 = vpop.f32.mrf.mxu3 }
 0x325   : > { %v1644_v22 = vmax.f32 %v1548_v19, 0.0  ;;  %v1768_v23 = vadd.f32 %v2495_v59, %v1767_v20 }
 0x326   : > { %v1448_v24 = vpop.f32.mrf.mxu2 }
 0x327   : > { %1832 = vst.msk [vmem:[%s2502_s13 + $0x58] sm:$0xff] %vm1820_vm0, %v1768_v23  ;;  %v1661_v25 = vpack.c.bf16 %v1644_v22, %v1643_v21  ;;  %v1483_v26 = vpack.c.bf16 %v1448_v24, %v1448_v24 }
 0x329   : > { %1809 = vmatmul.bf16.gmra.mxu3 %v1661_v25  ;;  %v1516_v27 = vunpack.c.l.bf16 %v1483_v26 }
 0x32b   : > { %v1549_v30 = vadd.f32 %v2459_v3, %v1516_v27 }
 0x32c   : > { %v1770_v9 = vpop.f32.mrf.mxu3 }
 0x32d   : > { %v1771_v28 = vadd.f32 %v2495_v59, %v1770_v9  ;;  %v1645_v34 = vmax.f32 %v1549_v30, 0.0 }
 0x32e   : > { %v1450_v29 = vpop.f32.mrf.mxu2 }
 0x32f   : > { %1833 = vst.msk [vmem:[%s2502_s13 + $0x60] sm:$0xff] %vm1820_vm0, %v1771_v28  ;;  %v1484_v42 = vpack.c.bf16 %v1450_v29, %v1450_v29 }
 0x331   : > { %v1517_v31 = vunpack.c.l.bf16 %v1484_v42 }
 0x333   : > { %v1550_v32 = vadd.f32 %v2459_v3, %v1517_v31 }
 0x334   : > { %v1772_v33 = vpop.f32.mrf.mxu3 }
 0x335   : > { %v1646_v44 = vmax.f32 %v1550_v32, 0.0  ;;  %v1773_v35 = vadd.f32 %v2495_v59, %v1772_v33 }
 0x337   : > { %1834 = vst.msk [vmem:[%s2502_s13 + $0x68] sm:$0xff] %vm1820_vm0, %v1773_v35  ;;  %v1662_v36 = vpack.c.bf16 %v1646_v44, %v1645_v34 }
 0x339   : > { %1814 = vmatmul.bf16.gmra.mxu3 %v1662_v36 }
 0x33c   : > { %v1775_v37 = vpop.f32.mrf.mxu3 }
 0x33d   : > { %v1776_v11 = vadd.f32 %v2495_v59, %v1775_v37 }
 0x33f   : > { %1835 = vst.msk [vmem:[%s2502_s13 + $0x70] sm:$0xff] %vm1820_vm0, %v1776_v11 }
 0x344   : > { %v1777_v38 = vpop.f32.mrf.mxu3 }
 0x345   : > { %v1778_v3 = vadd.f32 %v2495_v59, %v1777_v38 }
 0x347   : > { %1836 = vst.msk [vmem:[%s2502_s13 + $0x78] sm:$0xff] %vm1820_vm0, %v1778_v3 }
 0x34c   : > { %v1780_v39 = vpop.f32.mrf.mxu3 }
 0x34d   : > { %v1781_v18 = vadd.f32 %v2495_v59, %v1780_v39 }
 0x34f   : > { %1837 = vst.msk [vmem:[%s2502_s13 + $0x80] sm:$0xff] %vm1820_vm0, %v1781_v18 }
 0x354   : > { %v1782_v40 = vpop.f32.mrf.mxu3 }
 0x355   : > { %v1783_v41 = vadd.f32 %v2495_v59, %v1782_v40 }
 0x357   : > { %1838 = vst.msk [vmem:[%s2502_s13 + $0x88] sm:$0xff] %vm1820_vm0, %v1783_v41 }
 0x35c   : > { %v1785_v45 = vpop.f32.mrf.mxu3 }
 0x35d   : > { %v1786_v46 = vadd.f32 %v2495_v59, %v1785_v45 }
 0x35f   : > { %1839 = vst.msk [vmem:[%s2502_s13 + $0x90] sm:$0xff] %vm1820_vm0, %v1786_v46 }
 0x364   : > { %v1787_v47 = vpop.f32.mrf.mxu3 }
 0x365   : > { %v1788_v48 = vadd.f32 %v2495_v59, %v1787_v47 }
 0x367   : > { %1840 = vst.msk [vmem:[%s2502_s13 + $0x98] sm:$0xff] %vm1820_vm0, %v1788_v48 }
 0x36c   : > { %v1790_v49 = vpop.f32.mrf.mxu3 }
 0x36d   : > { %v1791_v50 = vadd.f32 %v2495_v59, %v1790_v49 }
 0x36f   : > { %1841 = vst.msk [vmem:[%s2502_s13 + $0xa0] sm:$0xff] %vm1820_vm0, %v1791_v50 }
 0x374   : > { %v1792_v51 = vpop.f32.mrf.mxu3 }
 0x375   : > { %v1793_v52 = vadd.f32 %v2495_v59, %v1792_v51 }
 0x377   : > { %1842 = vst.msk [vmem:[%s2502_s13 + $0xa8] sm:$0xff] %vm1820_vm0, %v1793_v52 }
 0x37c   : > { %v1795_v53 = vpop.f32.mrf.mxu3 }
 0x37d   : > { %v1796_v54 = vadd.f32 %v2495_v59, %v1795_v53 }
 0x37f   : > { %1843 = vst.msk [vmem:[%s2502_s13 + $0xb0] sm:$0xff] %vm1820_vm0, %v1796_v54 }
 0x384   : > { %v1797_v55 = vpop.f32.mrf.mxu3 }
 0x385   : > { %v1798_v56 = vadd.f32 %v2495_v59, %v1797_v55 }
 0x387   : > { %1844 = vst.msk [vmem:[%s2502_s13 + $0xb8] sm:$0xff] %vm1820_vm0, %v1798_v56 }
 0x38c   : > { %v1800_v57 = vpop.f32.mrf.mxu3 }
 0x38d   : > { %v1801_v58 = vadd.f32 %v2495_v59, %v1800_v57 }
 0x38f   : > { %1845 = vst.msk [vmem:[%s2502_s13 + $0xc0] sm:$0xff] %vm1820_vm0, %v1801_v58 }
 0x394   : > { %v1802_v60 = vpop.f32.mrf.mxu3 }
 0x395   : > { %v1803_v61 = vadd.f32 %v2495_v59, %v1802_v60 }
 0x397   : > { %1846 = vst.msk [vmem:[%s2502_s13 + $0xc8] sm:$0xff] %vm1820_vm0, %v1803_v61 }
 0x39c   : > { %v1805_v62 = vpop.f32.mrf.mxu3 }
 0x39d   : > { %v1806_v63 = vadd.f32 %v2495_v59, %v1805_v62 }
 0x39f   : > { %1847 = vst.msk [vmem:[%s2502_s13 + $0xd0] sm:$0xff] %vm1820_vm0, %v1806_v63 }
 0x3a4   : > { %v1807_v0 = vpop.f32.mrf.mxu3 }
 0x3a5   : > { %v1808_v1 = vadd.f32 %v2495_v59, %v1807_v0 }
 0x3a7   : > { %1848 = vst.msk [vmem:[%s2502_s13 + $0xd8] sm:$0xff] %vm1820_vm0, %v1808_v1 }
 0x3ac   : > { %v1810_v2 = vpop.f32.mrf.mxu3 }
 0x3ad   : > { %v1811_v4 = vadd.f32 %v2495_v59, %v1810_v2 }
 0x3af   : > { %1849 = vst.msk [vmem:[%s2502_s13 + $0xe0] sm:$0xff] %vm1820_vm0, %v1811_v4 }
 0x3b4   : > { %v1812_v5 = vpop.f32.mrf.mxu3 }
 0x3b5   : > { %v1813_v6 = vadd.f32 %v2495_v59, %v1812_v5 }
 0x3b7   : > { %1850 = vst.msk [vmem:[%s2502_s13 + $0xe8] sm:$0xff] %vm1820_vm0, %v1813_v6 }
 0x3bc   : > { %v1815_v7 = vpop.f32.mrf.mxu3 }
 0x3bd   : > { %v1816_v8 = vadd.f32 %v2495_v59, %v1815_v7 }
 0x3bf   : > { %1851 = vst.msk [vmem:[%s2502_s13 + $0xf0] sm:$0xff] %vm1820_vm0, %v1816_v8 }
 0x3c4   : > { %v1817_v10 = vpop.f32.mrf.mxu3 }
 0x3c5   : > { %v1818_v12 = vadd.f32 %v2495_v59, %v1817_v10 }
 0x3c7   : > { %1852 = vst.msk [vmem:[%s2502_s13 + $0xf8] sm:$0xff] %vm1820_vm0, %v1818_v12 }
 0x3c8 PF: > { %s16_s21 = sadd.s32 1, %s2132_s21  }
 0x3c9   : > { %p13_p4 = scmp.ge.s32.totalorder %s16_s21, 4  }
 0x3cb   :  { %15 = sbr.rel (!%p13_p4) target bundleno = 1 (0x1), region = 76 }

</bundles_post_ra>
